<compile_context>
chip_gen: v6e
topology: v6e:2x2x1
jax: 0.10.0
libtpu: 0.0.40
codegen_flags: <defaults>
</compile_context>

<pallas_src>
import math

import jax
import jax.numpy as jnp
from jax import lax
from jax.experimental import pallas as pl
from jax.experimental.pallas import tpu as pltpu

# ------------------------- synthetic small config -------------------------
PATCH = 14        # DINOv2 patch size
IMG = 28          # small image -> 2x2 = 4 patches
IN_CH = 3
EMBED = 32
DEPTH = 2
HEADS = 2
MLP_RATIO = 4
EPS = 1e-6
LS_INIT = 1e-5    # LayerScale init

HEAD_DIM = EMBED // HEADS
HIDDEN = MLP_RATIO * EMBED
GRID_H = IMG // PATCH
NUM_PATCHES = GRID_H * GRID_H
TOKENS = NUM_PATCHES + 1
TOKENS_PAD = ((TOKENS + 7) // 8) * 8          # pad tokens to a sublane multiple
PATCH_DIM = IN_CH * PATCH * PATCH
ATTN_SCALE = HEAD_DIM ** -0.5
INV_SQRT2 = 1.0 / math.sqrt(2.0)
NEG_INF = -1e9


# ------------------------------ kernel helpers ------------------------------
def _layernorm(x, g, b):
    mean = jnp.mean(x, axis=-1, keepdims=True)
    xc = x - mean
    var = jnp.mean(xc * xc, axis=-1, keepdims=True)
    return xc * lax.rsqrt(var + EPS) * g + b


def _gelu_exact(x):
    # exact (erf-based) GELU, matching torch.nn.GELU default
    return 0.5 * x * (1.0 + lax.erf(x * INV_SQRT2))


# ------------------------------ fused kernel --------------------------------
def _make_kernel(bt):
    rows = bt * TOKENS_PAD
    bf = jnp.bfloat16

    def kernel(patches_ref, pw_ref, pb_ref, clspos_ref, pospat_ref,
               n1g_ref, n1b_ref, qw_ref, qb_ref, kw_ref, kb_ref, vw_ref, vb_ref,
               pjw_ref, pjb_ref, ls1_ref,
               n2g_ref, n2b_ref, fc1w_ref, fc1b_ref, fc2w_ref, fc2b_ref, ls2_ref,
               ng_ref, nb_ref,
               out_ref, x_vmem):
        d = pl.program_id(1)

        # ---- layer 0: patch embed + cls + pos-embed into the residual scratch
        @pl.when(d == 0)
        def _init():
            tok = jnp.dot(patches_ref[...].astype(bf), pw_ref[...],
                          preferred_element_type=jnp.float32) + pb_ref[...]
            x_vmem[:, 0:1, :] = jnp.broadcast_to(clspos_ref[...], (bt, 1, EMBED))
            for i in range(bt):
                x_vmem[i, 1:1 + NUM_PATCHES, :] = (
                    tok[i * NUM_PATCHES:(i + 1) * NUM_PATCHES, :] + pospat_ref[...])
            if TOKENS < TOKENS_PAD:
                x_vmem[:, TOKENS:, :] = jnp.zeros(
                    (bt, TOKENS_PAD - TOKENS, EMBED), jnp.float32)

        x = x_vmem[...].reshape(rows, EMBED)            # [Bt*Tp, D] residual

        # additive key mask for the padded token rows
        col = lax.broadcasted_iota(jnp.int32, (1, 1, TOKENS_PAD), 2)
        kmask = jnp.where(col < TOKENS, 0.0, NEG_INF).astype(jnp.float32)

        # ---------------- attention branch ----------------
        y = _layernorm(x, n1g_ref[...], n1b_ref[...])
        yb = y.astype(bf)
        attn = jnp.zeros((rows, EMBED), jnp.float32)
        for h in range(HEADS):
            q = jnp.dot(yb, qw_ref[h], preferred_element_type=jnp.float32)
            k = jnp.dot(yb, kw_ref[h], preferred_element_type=jnp.float32)
            v = jnp.dot(yb, vw_ref[h], preferred_element_type=jnp.float32)
            q = (q.reshape(bt, TOKENS_PAD, HEAD_DIM) + qb_ref[h]) * ATTN_SCALE
            k = k.reshape(bt, TOKENS_PAD, HEAD_DIM) + kb_ref[h]
            v = v.reshape(bt, TOKENS_PAD, HEAD_DIM) + vb_ref[h]
            s = jnp.einsum("bqd,bkd->bqk", q.astype(bf), k.astype(bf),
                           preferred_element_type=jnp.float32) + kmask
            s = s - jnp.max(s, axis=-1, keepdims=True)
            p = jnp.exp(s)
            p = p / jnp.sum(p, axis=-1, keepdims=True)   # exact div: f32 parity
            o = jnp.einsum("bqk,bkd->bqd", p.astype(bf), v.astype(bf),
                           preferred_element_type=jnp.float32)
            # fold the output projection per head into one f32 accumulator
            attn = attn + jnp.dot(o.reshape(rows, HEAD_DIM).astype(bf),
                                  pjw_ref[h], preferred_element_type=jnp.float32)
        x = x + ls1_ref[...] * (attn + pjb_ref[...])     # residual + LayerScale

        # ---------------- MLP branch ----------------
        y = _layernorm(x, n2g_ref[...], n2b_ref[...])
        hdn = jnp.dot(y.astype(bf), fc1w_ref[...],
                      preferred_element_type=jnp.float32) + fc1b_ref[...]
        hdn = _gelu_exact(hdn)
        m = jnp.dot(hdn.astype(bf), fc2w_ref[...],
                    preferred_element_type=jnp.float32) + fc2b_ref[...]
        x = x + ls2_ref[...] * m

        x_vmem[...] = x.reshape(bt, TOKENS_PAD, EMBED)   # carry to next layer

        # ---- last layer: final LN on CLS rows only, write (Bt, EMBED) slab
        @pl.when(d == DEPTH - 1)
        def _final():
            xcls = x.reshape(bt, TOKENS_PAD, EMBED)[:, 0, :]
            out_ref[...] = _layernorm(xcls, ng_ref[...], nb_ref[...])

    return kernel


# ------------------------------ parameters ------------------------------
def init_params(key):
    keys = iter(jax.random.split(key, 128))

    def nrm(shape, scale=0.02):
        return scale * jax.random.normal(next(keys), shape, jnp.float32)

    params = {
        "patch_w": nrm((PATCH_DIM, EMBED)),          # Conv2d(3, D, 14, 14) reshaped
        "patch_b": nrm((EMBED,)),
        "cls_token": nrm((1, 1, EMBED)),
        "pos_embed": nrm((1, TOKENS, EMBED)),
        "norm_g": jnp.ones((EMBED,), jnp.float32),
        "norm_b": jnp.zeros((EMBED,), jnp.float32),
        "blocks": [],
    }
    for _ in range(DEPTH):
        params["blocks"].append(dict(
            norm1_g=jnp.ones((EMBED,), jnp.float32),
            norm1_b=jnp.zeros((EMBED,), jnp.float32),
            qkv_w=nrm((EMBED, 3 * EMBED)),
            qkv_b=nrm((3 * EMBED,)),
            proj_w=nrm((EMBED, EMBED)),
            proj_b=nrm((EMBED,)),
            ls1=jnp.full((EMBED,), LS_INIT, jnp.float32),
            norm2_g=jnp.ones((EMBED,), jnp.float32),
            norm2_b=jnp.zeros((EMBED,), jnp.float32),
            fc1_w=nrm((EMBED, HIDDEN)),
            fc1_b=nrm((HIDDEN,)),
            fc2_w=nrm((HIDDEN, EMBED)),
            fc2_b=nrm((EMBED,)),
            ls2=jnp.full((EMBED,), LS_INIT, jnp.float32),
        ))
    return params


def _prepare_args(params):
    """Stack per-block params over depth, pre-split QKV/proj per head and cast
    matmul weights to bf16 (f32 accumulation happens in-kernel)."""
    blocks = params["blocks"]
    bf = jnp.bfloat16

    def stack(name):
        return jnp.stack([blk[name] for blk in blocks])

    def rows(name, width):
        return stack(name).reshape(DEPTH, 1, width)

    qkv_w = stack("qkv_w").reshape(DEPTH, EMBED, 3, HEADS, HEAD_DIM)
    qkv_w = qkv_w.transpose(0, 2, 3, 1, 4)               # [DEPTH, 3, H, E, dh]
    qkv_b = stack("qkv_b").reshape(DEPTH, 3, HEADS, 1, HEAD_DIM)
    proj_w = stack("proj_w").reshape(DEPTH, HEADS, HEAD_DIM, EMBED)

    clspos = (params["cls_token"].reshape(1, EMBED)
              + params["pos_embed"][0, 0:1, :])          # folded at trace time
    pospat = params["pos_embed"][0, 1:, :]               # [N, D]

    return dict(
        patch_w=params["patch_w"].astype(bf),
        patch_b=params["patch_b"].reshape(1, EMBED),
        clspos=clspos, pospat=pospat,
        n1g=rows("norm1_g", EMBED), n1b=rows("norm1_b", EMBED),
        qw=qkv_w[:, 0].astype(bf), qb=qkv_b[:, 0],
        kw=qkv_w[:, 1].astype(bf), kb=qkv_b[:, 1],
        vw=qkv_w[:, 2].astype(bf), vb=qkv_b[:, 2],
        pjw=proj_w.astype(bf), pjb=rows("proj_b", EMBED),
        ls1=rows("ls1", EMBED),
        n2g=rows("norm2_g", EMBED), n2b=rows("norm2_b", EMBED),
        fc1w=stack("fc1_w").astype(bf), fc1b=rows("fc1_b", HIDDEN),
        fc2w=stack("fc2_w").astype(bf), fc2b=rows("fc2_b", EMBED),
        ls2=rows("ls2", EMBED),
        norm_g=params["norm_g"].reshape(1, EMBED),
        norm_b=params["norm_b"].reshape(1, EMBED),
    )


# ------------------------------ specs & wrapper ------------------------------
def _const_spec(shape):
    n = len(shape)
    return pl.BlockSpec(shape, lambda b, d, _n=n: (0,) * _n)


def _layer_spec(shape):
    # per-layer param stacked over DEPTH; stream layer d (double-buffered DMA)
    n = len(shape)
    return pl.BlockSpec((None,) + shape, lambda b, d, _n=n: (d,) + (0,) * _n)


def _pick_block_b(batch):
    # several images per grid step (MXU rows) while keeping >=2 grid steps on
    # the parallel batch axis so v7x megacore gets balanced work
    for cand in (16, 8, 4, 2, 1):
        if batch % cand == 0 and batch // cand >= 2:
            return cand
    return batch


def dinov2_forward(params, x, *, block_b=None):
    # x: [B, C, H, W] NCHW float32
    B, C, H, W = x.shape
    gh, gw = H // PATCH, W // PATCH
    assert (C, gh * gw) == (IN_CH, NUM_PATCHES)

    bt = _pick_block_b(B) if block_b is None else block_b
    assert B % bt == 0
    assert (bt * NUM_PATCHES) % 8 == 0 or bt == B

    # Patch extraction (one-time, tiny): Conv2d weight [D, C, P, P] flattens
    # input patches in (c, p, q) order. Pre-flattened to 2D rows here so the
    # kernel's patch-embed matmul needs no in-kernel reshape.
    patches = x.reshape(B, C, gh, PATCH, gw, PATCH)
    patches = patches.transpose(0, 2, 4, 1, 3, 5).reshape(B * NUM_PATCHES, PATCH_DIM)

    a = _prepare_args(params)
    args = (patches, a["patch_w"], a["patch_b"], a["clspos"], a["pospat"],
            a["n1g"], a["n1b"], a["qw"], a["qb"], a["kw"], a["kb"], a["vw"], a["vb"],
            a["pjw"], a["pjb"], a["ls1"], a["n2g"], a["n2b"],
            a["fc1w"], a["fc1b"], a["fc2w"], a["fc2b"], a["ls2"],
            a["norm_g"], a["norm_b"])

    in_specs = [
        pl.BlockSpec((bt * NUM_PATCHES, PATCH_DIM), lambda b, d: (b, 0)),  # patches
        _const_spec((PATCH_DIM, EMBED)),              # patch_w
        _const_spec((1, EMBED)),                      # patch_b
        _const_spec((1, EMBED)),                      # clspos
        _const_spec((NUM_PATCHES, EMBED)),            # pospat
        _layer_spec((1, EMBED)),                      # n1g
        _layer_spec((1, EMBED)),                      # n1b
        _layer_spec((HEADS, EMBED, HEAD_DIM)),        # qw
        _layer_spec((HEADS, 1, HEAD_DIM)),            # qb
        _layer_spec((HEADS, EMBED, HEAD_DIM)),        # kw
        _layer_spec((HEADS, 1, HEAD_DIM)),            # kb
        _layer_spec((HEADS, EMBED, HEAD_DIM)),        # vw
        _layer_spec((HEADS, 1, HEAD_DIM)),            # vb
        _layer_spec((HEADS, HEAD_DIM, EMBED)),        # pjw
        _layer_spec((1, EMBED)),                      # pjb
        _layer_spec((1, EMBED)),                      # ls1
        _layer_spec((1, EMBED)),                      # n2g
        _layer_spec((1, EMBED)),                      # n2b
        _layer_spec((EMBED, HIDDEN)),                 # fc1w
        _layer_spec((1, HIDDEN)),                     # fc1b
        _layer_spec((HIDDEN, EMBED)),                 # fc2w
        _layer_spec((1, EMBED)),                      # fc2b
        _layer_spec((1, EMBED)),                      # ls2
        _const_spec((1, EMBED)),                      # norm_g
        _const_spec((1, EMBED)),                      # norm_b
    ]

    nb_blocks = B // bt
    out = pl.pallas_call(
        _make_kernel(bt),
        out_shape=jax.ShapeDtypeStruct((nb_blocks, bt, EMBED), jnp.float32),
        grid_spec=pltpu.PrefetchScalarGridSpec(
            num_scalar_prefetch=0,
            grid=(nb_blocks, DEPTH),
            in_specs=in_specs,
            out_specs=pl.BlockSpec((None, bt, EMBED), lambda b, d: (b, 0, 0)),
            scratch_shapes=[pltpu.VMEM((bt, TOKENS_PAD, EMBED), jnp.float32)],
        ),
        compiler_params=pltpu.CompilerParams(
            dimension_semantics=("parallel", "arbitrary"),
        ),
    )(*args)

    # DINOv2 hub forward = head(x_norm_clstoken); head is Identity
    return out.reshape(B, EMBED)


# ------------------------------ pure-JAX reference ------------------------------
def dinov2_reference(params, x):
    B, C, H, W = x.shape
    gh, gw = H // PATCH, W // PATCH
    N = gh * gw
    patches = x.reshape(B, C, gh, PATCH, gw, PATCH)
    patches = patches.transpose(0, 2, 4, 1, 3, 5).reshape(B * N, PATCH_DIM)
    tok = (patches @ params["patch_w"] + params["patch_b"]).reshape(B, N, EMBED)
    cls = jnp.broadcast_to(params["cls_token"], (B, 1, EMBED))
    xt = jnp.concatenate([cls, tok], axis=1) + params["pos_embed"]
    T = N + 1
    xt = xt.reshape(B * T, EMBED)

    def ln(v, g, b):
        mu = v.mean(-1, keepdims=True)
        vc = v - mu
        var = (vc * vc).mean(-1, keepdims=True)
        return vc / jnp.sqrt(var + EPS) * g + b

    for blk in params["blocks"]:
        y = ln(xt, blk["norm1_g"], blk["norm1_b"])
        qkv = (y @ blk["qkv_w"] + blk["qkv_b"]).reshape(B, T, 3, HEADS, HEAD_DIM)
        qkv = qkv.transpose(2, 0, 3, 1, 4)
        q, k, v = qkv[0] * ATTN_SCALE, qkv[1], qkv[2]
        p = jax.nn.softmax(jnp.einsum("bhqd,bhkd->bhqk", q, k), axis=-1)
        o = jnp.einsum("bhqk,bhkd->bhqd", p, v)
        o = o.transpose(0, 2, 1, 3).reshape(B * T, EMBED)
        xt = xt + blk["ls1"] * (o @ blk["proj_w"] + blk["proj_b"])
        y = ln(xt, blk["norm2_g"], blk["norm2_b"])
        hdn = y @ blk["fc1_w"] + blk["fc1_b"]
        hdn = 0.5 * hdn * (1.0 + lax.erf(hdn * INV_SQRT2))
        xt = xt + blk["ls2"] * (hdn @ blk["fc2_w"] + blk["fc2_b"])
    xt = ln(xt, params["norm_g"], params["norm_b"])
    return xt.reshape(B, T, EMBED)[:, 0]


if __name__ == "__main__":
    key = jax.random.PRNGKey(0)
    pkey, xkey = jax.random.split(key)
    params = init_params(pkey)
    B = 8
    x = jax.random.normal(xkey, (B, IN_CH, IMG, IMG), jnp.float32)

    out = jax.jit(dinov2_forward)(params, x)
    out = jax.block_until_ready(out)
    assert out.shape == (B, EMBED), out.shape
    assert bool(jnp.all(jnp.isfinite(out)))

    ref = dinov2_reference(params, x)
    assert jnp.allclose(out, ref, rtol=1e-2, atol=1e-2), float(
        jnp.max(jnp.abs(out - ref)))
    print("KERNEL_OK")
</pallas_src>

<mosaic_0001>
module attributes {stable_mosaic.version = 11 : i64} {
  func.func @kernel(%arg0: i32, %arg1: i32, %arg2: memref<16x588xf32, #tpu.memory_space<vmem>>, %arg3: memref<588x32xbf16, #tpu.memory_space<vmem>>, %arg4: memref<1x32xf32, #tpu.memory_space<vmem>>, %arg5: memref<1x32xf32, #tpu.memory_space<vmem>>, %arg6: memref<4x32xf32, #tpu.memory_space<vmem>>, %arg7: memref<1x1x32xf32, #tpu.memory_space<vmem>>, %arg8: memref<1x1x32xf32, #tpu.memory_space<vmem>>, %arg9: memref<1x2x32x16xbf16, #tpu.memory_space<vmem>>, %arg10: memref<1x2x1x16xf32, #tpu.memory_space<vmem>>, %arg11: memref<1x2x32x16xbf16, #tpu.memory_space<vmem>>, %arg12: memref<1x2x1x16xf32, #tpu.memory_space<vmem>>, %arg13: memref<1x2x32x16xbf16, #tpu.memory_space<vmem>>, %arg14: memref<1x2x1x16xf32, #tpu.memory_space<vmem>>, %arg15: memref<1x2x16x32xbf16, #tpu.memory_space<vmem>>, %arg16: memref<1x1x32xf32, #tpu.memory_space<vmem>>, %arg17: memref<1x1x32xf32, #tpu.memory_space<vmem>>, %arg18: memref<1x1x32xf32, #tpu.memory_space<vmem>>, %arg19: memref<1x1x32xf32, #tpu.memory_space<vmem>>, %arg20: memref<1x32x128xbf16, #tpu.memory_space<vmem>>, %arg21: memref<1x1x128xf32, #tpu.memory_space<vmem>>, %arg22: memref<1x128x32xbf16, #tpu.memory_space<vmem>>, %arg23: memref<1x1x32xf32, #tpu.memory_space<vmem>>, %arg24: memref<1x1x32xf32, #tpu.memory_space<vmem>>, %arg25: memref<1x32xf32, #tpu.memory_space<vmem>>, %arg26: memref<1x32xf32, #tpu.memory_space<vmem>>, %arg27: memref<1x4x32xf32, #tpu.memory_space<vmem>>, %arg28: memref<4x8x32xf32, #tpu.memory_space<vmem>>) attributes {dimension_semantics = [#tpu.dimension_semantics<parallel>, #tpu.dimension_semantics<arbitrary>], iteration_bounds = array<i64: 2, 2>, scalar_prefetch = 0 : i64, scratch_operands = 1 : i64, tpu.core_type = #tpu.core_type<tc>, window_params = [{transform_indices = @transform_0, window_bounds = array<i64: 16, 588>}, {pipeline_mode = #tpu.pipeline_mode<synchronous>, transform_indices = @transform_1, window_bounds = array<i64: 588, 32>}, {pipeline_mode = #tpu.pipeline_mode<synchronous>, transform_indices = @transform_2, window_bounds = array<i64: 1, 32>}, {pipeline_mode = #tpu.pipeline_mode<synchronous>, transform_indices = @transform_3, window_bounds = array<i64: 1, 32>}, {pipeline_mode = #tpu.pipeline_mode<synchronous>, transform_indices = @transform_4, window_bounds = array<i64: 4, 32>}, {transform_indices = @transform_5, window_bounds = array<i64: 1, 1, 32>}, {transform_indices = @transform_6, window_bounds = array<i64: 1, 1, 32>}, {transform_indices = @transform_7, window_bounds = array<i64: 1, 2, 32, 16>}, {transform_indices = @transform_8, window_bounds = array<i64: 1, 2, 1, 16>}, {transform_indices = @transform_9, window_bounds = array<i64: 1, 2, 32, 16>}, {transform_indices = @transform_10, window_bounds = array<i64: 1, 2, 1, 16>}, {transform_indices = @transform_11, window_bounds = array<i64: 1, 2, 32, 16>}, {transform_indices = @transform_12, window_bounds = array<i64: 1, 2, 1, 16>}, {transform_indices = @transform_13, window_bounds = array<i64: 1, 2, 16, 32>}, {transform_indices = @transform_14, window_bounds = array<i64: 1, 1, 32>}, {transform_indices = @transform_15, window_bounds = array<i64: 1, 1, 32>}, {transform_indices = @transform_16, window_bounds = array<i64: 1, 1, 32>}, {transform_indices = @transform_17, window_bounds = array<i64: 1, 1, 32>}, {transform_indices = @transform_18, window_bounds = array<i64: 1, 32, 128>}, {transform_indices = @transform_19, window_bounds = array<i64: 1, 1, 128>}, {transform_indices = @transform_20, window_bounds = array<i64: 1, 128, 32>}, {transform_indices = @transform_21, window_bounds = array<i64: 1, 1, 32>}, {transform_indices = @transform_22, window_bounds = array<i64: 1, 1, 32>}, {pipeline_mode = #tpu.pipeline_mode<synchronous>, transform_indices = @transform_23, window_bounds = array<i64: 1, 32>}, {pipeline_mode = #tpu.pipeline_mode<synchronous>, transform_indices = @transform_24, window_bounds = array<i64: 1, 32>}, {transform_indices = @transform_25, window_bounds = array<i64: 1, 4, 32>}]} {
    %c0_i32 = arith.constant 0 : i32
    %0 = arith.cmpi eq, %arg1, %c0_i32 : i32
    %1 = arith.extui %0 : i1 to i32
    %c0_i32_0 = arith.constant 0 : i32
    %2 = arith.cmpi ne, %1, %c0_i32_0 : i32
    scf.if %2 {
      %c0_130 = arith.constant 0 : index
      %c0_131 = arith.constant 0 : index
      %208 = vector.load %arg2[%c0_130, %c0_131] : memref<16x588xf32, #tpu.memory_space<vmem>>, vector<16x588xf32>
      %209 = arith.truncf %208 : vector<16x588xf32> to vector<16x588xbf16>
      %c0_132 = arith.constant 0 : index
      %c0_133 = arith.constant 0 : index
      %210 = vector.load %arg3[%c0_132, %c0_133] : memref<588x32xbf16, #tpu.memory_space<vmem>>, vector<588x32xbf16>
      %cst_134 = arith.constant dense<0.000000e+00> : vector<16x32xf32>
      %211 = tpu.matmul %209, %210, %cst_134 {dimension_numbers = #tpu.dot_dimension_numbers<[1], [0], [0], [1], [0, 0, 1, 1], [], []>} : vector<16x588xbf16>, vector<588x32xbf16>, vector<16x32xf32> -> vector<16x32xf32>
      %c0_135 = arith.constant 0 : index
      %c0_136 = arith.constant 0 : index
      %212 = vector.load %arg4[%c0_135, %c0_136] : memref<1x32xf32, #tpu.memory_space<vmem>>, vector<1x32xf32>
      %213 = vector.broadcast %212 : vector<1x32xf32> to vector<16x32xf32>
      %214 = arith.addf %211, %213 : vector<16x32xf32>
      %c0_137 = arith.constant 0 : index
      %c0_138 = arith.constant 0 : index
      %215 = vector.load %arg5[%c0_137, %c0_138] : memref<1x32xf32, #tpu.memory_space<vmem>>, vector<1x32xf32>
      %216 = vector.shape_cast %215 : vector<1x32xf32> to vector<1x1x32xf32>
      %217 = vector.broadcast %216 : vector<1x1x32xf32> to vector<4x1x32xf32>
      %c0_139 = arith.constant 0 : index
      %c0_140 = arith.constant 0 : index
      %c0_141 = arith.constant 0 : index
      %218 = vector.load %arg28[%c0_139, %c0_140, %c0_141] : memref<4x8x32xf32, #tpu.memory_space<vmem>>, vector<4x1x32xf32>
      tpu.vector_store %arg28[%c0_139, %c0_140, %c0_141], %217 {strides = array<i32>} : memref<4x8x32xf32, #tpu.memory_space<vmem>>, vector<4x1x32xf32>,
      %219 = vector.extract_strided_slice %214 {offsets = [0, 0], sizes = [4, 32], strides = [1, 1]} : vector<16x32xf32> to vector<4x32xf32>
      %c0_142 = arith.constant 0 : index
      %c0_143 = arith.constant 0 : index
      %220 = vector.load %arg6[%c0_142, %c0_143] : memref<4x32xf32, #tpu.memory_space<vmem>>, vector<4x32xf32>
      %221 = arith.addf %219, %220 : vector<4x32xf32>
      %c0_144 = arith.constant 0 : index
      %c1_145 = arith.constant 1 : index
      %c0_146 = arith.constant 0 : index
      %222 = vector.load %arg28[%c0_144, %c1_145, %c0_146] : memref<4x8x32xf32, #tpu.memory_space<vmem>>, vector<1x4x32xf32>
      %223 = vector.shape_cast %222 : vector<1x4x32xf32> to vector<4x32xf32>
      %224 = vector.shape_cast %221 : vector<4x32xf32> to vector<1x4x32xf32>
      tpu.vector_store %arg28[%c0_144, %c1_145, %c0_146], %224 {strides = array<i32>} : memref<4x8x32xf32, #tpu.memory_space<vmem>>, vector<1x4x32xf32>,
      %225 = vector.extract_strided_slice %214 {offsets = [4, 0], sizes = [4, 32], strides = [1, 1]} : vector<16x32xf32> to vector<4x32xf32>
      %c0_147 = arith.constant 0 : index
      %c0_148 = arith.constant 0 : index
      %226 = vector.load %arg6[%c0_147, %c0_148] : memref<4x32xf32, #tpu.memory_space<vmem>>, vector<4x32xf32>
      %227 = arith.addf %225, %226 : vector<4x32xf32>
      %c1_149 = arith.constant 1 : index
      %c1_150 = arith.constant 1 : index
      %c0_151 = arith.constant 0 : index
      %228 = vector.load %arg28[%c1_149, %c1_150, %c0_151] : memref<4x8x32xf32, #tpu.memory_space<vmem>>, vector<1x4x32xf32>
      %229 = vector.shape_cast %228 : vector<1x4x32xf32> to vector<4x32xf32>
      %230 = vector.shape_cast %227 : vector<4x32xf32> to vector<1x4x32xf32>
      tpu.vector_store %arg28[%c1_149, %c1_150, %c0_151], %230 {strides = array<i32>} : memref<4x8x32xf32, #tpu.memory_space<vmem>>, vector<1x4x32xf32>,
      %231 = vector.extract_strided_slice %214 {offsets = [8, 0], sizes = [4, 32], strides = [1, 1]} : vector<16x32xf32> to vector<4x32xf32>
      %c0_152 = arith.constant 0 : index
      %c0_153 = arith.constant 0 : index
      %232 = vector.load %arg6[%c0_152, %c0_153] : memref<4x32xf32, #tpu.memory_space<vmem>>, vector<4x32xf32>
      %233 = arith.addf %231, %232 : vector<4x32xf32>
      %c2 = arith.constant 2 : index
      %c1_154 = arith.constant 1 : index
      %c0_155 = arith.constant 0 : index
      %234 = vector.load %arg28[%c2, %c1_154, %c0_155] : memref<4x8x32xf32, #tpu.memory_space<vmem>>, vector<1x4x32xf32>
      %235 = vector.shape_cast %234 : vector<1x4x32xf32> to vector<4x32xf32>
      %236 = vector.shape_cast %233 : vector<4x32xf32> to vector<1x4x32xf32>
      tpu.vector_store %arg28[%c2, %c1_154, %c0_155], %236 {strides = array<i32>} : memref<4x8x32xf32, #tpu.memory_space<vmem>>, vector<1x4x32xf32>,
      %237 = vector.extract_strided_slice %214 {offsets = [12, 0], sizes = [4, 32], strides = [1, 1]} : vector<16x32xf32> to vector<4x32xf32>
      %c0_156 = arith.constant 0 : index
      %c0_157 = arith.constant 0 : index
      %238 = vector.load %arg6[%c0_156, %c0_157] : memref<4x32xf32, #tpu.memory_space<vmem>>, vector<4x32xf32>
      %239 = arith.addf %237, %238 : vector<4x32xf32>
      %c3 = arith.constant 3 : index
      %c1_158 = arith.constant 1 : index
      %c0_159 = arith.constant 0 : index
      %240 = vector.load %arg28[%c3, %c1_158, %c0_159] : memref<4x8x32xf32, #tpu.memory_space<vmem>>, vector<1x4x32xf32>
      %241 = vector.shape_cast %240 : vector<1x4x32xf32> to vector<4x32xf32>
      %242 = vector.shape_cast %239 : vector<4x32xf32> to vector<1x4x32xf32>
      tpu.vector_store %arg28[%c3, %c1_158, %c0_159], %242 {strides = array<i32>} : memref<4x8x32xf32, #tpu.memory_space<vmem>>, vector<1x4x32xf32>,
      %cst_160 = arith.constant 0.000000e+00 : f32
      %243 = vector.broadcast %cst_160 : f32 to vector<4x3x32xf32>
      %c0_161 = arith.constant 0 : index
      %c5 = arith.constant 5 : index
      %c0_162 = arith.constant 0 : index
      %244 = vector.load %arg28[%c0_161, %c5, %c0_162] : memref<4x8x32xf32, #tpu.memory_space<vmem>>, vector<4x3x32xf32>
      tpu.vector_store %arg28[%c0_161, %c5, %c0_162], %243 {strides = array<i32>} : memref<4x8x32xf32, #tpu.memory_space<vmem>>, vector<4x3x32xf32>,
    } else {
    }
    %c0 = arith.constant 0 : index
    %c0_1 = arith.constant 0 : index
    %c0_2 = arith.constant 0 : index
    %3 = vector.load %arg28[%c0, %c0_1, %c0_2] : memref<4x8x32xf32, #tpu.memory_space<vmem>>, vector<4x8x32xf32>
    %4 = vector.shape_cast %3 : vector<4x8x32xf32> to vector<32x32xf32>
    %5 = tpu.iota {dimensions = array<i32: 2>} : vector<1x1x8xi32>
    %c5_i32 = arith.constant 5 : i32
    %6 = vector.broadcast %c5_i32 : i32 to vector<1x1x8xi32>
    %7 = arith.cmpi slt, %5, %6 : vector<1x1x8xi32>
    %cst = arith.constant 0.000000e+00 : f32
    %cst_3 = arith.constant -1.000000e+09 : f32
    %8 = vector.broadcast %cst : f32 to vector<1x1x8xf32>
    %9 = vector.broadcast %cst_3 : f32 to vector<1x1x8xf32>
    %10 = arith.select %7, %8, %9 : vector<1x1x8xi1>, vector<1x1x8xf32>
    %c0_4 = arith.constant 0 : index
    %c0_5 = arith.constant 0 : index
    %c0_6 = arith.constant 0 : index
    %11 = vector.load %arg7[%c0_4, %c0_5, %c0_6] : memref<1x1x32xf32, #tpu.memory_space<vmem>>, vector<1x1x32xf32>
    %12 = vector.shape_cast %11 : vector<1x1x32xf32> to vector<1x32xf32>
    %c0_7 = arith.constant 0 : index
    %c0_8 = arith.constant 0 : index
    %c0_9 = arith.constant 0 : index
    %13 = vector.load %arg8[%c0_7, %c0_8, %c0_9] : memref<1x1x32xf32, #tpu.memory_space<vmem>>, vector<1x1x32xf32>
    %14 = vector.shape_cast %13 : vector<1x1x32xf32> to vector<1x32xf32>
    %cst_10 = arith.constant dense<0.000000e+00> : vector<32xf32>
    %15 = vector.multi_reduction <add>, %4, %cst_10 [1] : vector<32x32xf32> to vector<32xf32>
    %16 = vector.shape_cast %15 : vector<32xf32> to vector<32x1xf32>
    %cst_11 = arith.constant 3.200000e+01 : f32
    %17 = vector.broadcast %cst_11 : f32 to vector<32x1xf32>
    %18 = arith.divf %16, %17 : vector<32x1xf32>
    %19 = vector.broadcast %18 : vector<32x1xf32> to vector<32x32xf32>
    %20 = arith.subf %4, %19 : vector<32x32xf32>
    %21 = arith.mulf %20, %20 : vector<32x32xf32>
    %cst_12 = arith.constant dense<0.000000e+00> : vector<32xf32>
    %22 = vector.multi_reduction <add>, %21, %cst_12 [1] : vector<32x32xf32> to vector<32xf32>
    %23 = vector.shape_cast %22 : vector<32xf32> to vector<32x1xf32>
    %cst_13 = arith.constant 3.200000e+01 : f32
    %24 = vector.broadcast %cst_13 : f32 to vector<32x1xf32>
    %25 = arith.divf %23, %24 : vector<32x1xf32>
    %cst_14 = arith.constant 9.99999997E-7 : f32
    %26 = vector.broadcast %cst_14 : f32 to vector<32x1xf32>
    %27 = arith.addf %25, %26 : vector<32x1xf32>
    %28 = math.rsqrt %27 : vector<32x1xf32>
    %29 = vector.broadcast %28 : vector<32x1xf32> to vector<32x32xf32>
    %30 = arith.mulf %20, %29 : vector<32x32xf32>
    %31 = vector.broadcast %12 : vector<1x32xf32> to vector<32x32xf32>
    %32 = arith.mulf %30, %31 : vector<32x32xf32>
    %33 = vector.broadcast %14 : vector<1x32xf32> to vector<32x32xf32>
    %34 = arith.addf %32, %33 : vector<32x32xf32>
    %35 = arith.truncf %34 : vector<32x32xf32> to vector<32x32xbf16>
    %cst_15 = arith.constant 0.000000e+00 : f32
    %36 = vector.broadcast %cst_15 : f32 to vector<32x32xf32>
    %c0_16 = arith.constant 0 : index
    %c0_17 = arith.constant 0 : index
    %c0_18 = arith.constant 0 : index
    %c0_19 = arith.constant 0 : index
    %37 = vector.load %arg9[%c0_16, %c0_17, %c0_18, %c0_19] : memref<1x2x32x16xbf16, #tpu.memory_space<vmem>>, vector<1x1x32x16xbf16>
    %38 = vector.shape_cast %37 : vector<1x1x32x16xbf16> to vector<32x16xbf16>
    %cst_20 = arith.constant dense<0.000000e+00> : vector<32x16xf32>
    %39 = tpu.matmul %35, %38, %cst_20 {dimension_numbers = #tpu.dot_dimension_numbers<[1], [0], [0], [1], [0, 0, 1, 1], [], []>} : vector<32x32xbf16>, vector<32x16xbf16>, vector<32x16xf32> -> vector<32x16xf32>
    %c0_21 = arith.constant 0 : index
    %c0_22 = arith.constant 0 : index
    %c0_23 = arith.constant 0 : index
    %c0_24 = arith.constant 0 : index
    %40 = vector.load %arg11[%c0_21, %c0_22, %c0_23, %c0_24] : memref<1x2x32x16xbf16, #tpu.memory_space<vmem>>, vector<1x1x32x16xbf16>
    %41 = vector.shape_cast %40 : vector<1x1x32x16xbf16> to vector<32x16xbf16>
    %cst_25 = arith.constant dense<0.000000e+00> : vector<32x16xf32>
    %42 = tpu.matmul %35, %41, %cst_25 {dimension_numbers = #tpu.dot_dimension_numbers<[1], [0], [0], [1], [0, 0, 1, 1], [], []>} : vector<32x32xbf16>, vector<32x16xbf16>, vector<32x16xf32> -> vector<32x16xf32>
    %c0_26 = arith.constant 0 : index
    %c0_27 = arith.constant 0 : index
    %c0_28 = arith.constant 0 : index
    %c0_29 = arith.constant 0 : index
    %43 = vector.load %arg13[%c0_26, %c0_27, %c0_28, %c0_29] : memref<1x2x32x16xbf16, #tpu.memory_space<vmem>>, vector<1x1x32x16xbf16>
    %44 = vector.shape_cast %43 : vector<1x1x32x16xbf16> to vector<32x16xbf16>
    %cst_30 = arith.constant dense<0.000000e+00> : vector<32x16xf32>
    %45 = tpu.matmul %35, %44, %cst_30 {dimension_numbers = #tpu.dot_dimension_numbers<[1], [0], [0], [1], [0, 0, 1, 1], [], []>} : vector<32x32xbf16>, vector<32x16xbf16>, vector<32x16xf32> -> vector<32x16xf32>
    %46 = vector.shape_cast %39 : vector<32x16xf32> to vector<4x8x16xf32>
    %c0_31 = arith.constant 0 : index
    %c0_32 = arith.constant 0 : index
    %c0_33 = arith.constant 0 : index
    %c0_34 = arith.constant 0 : index
    %47 = vector.load %arg10[%c0_31, %c0_32, %c0_33, %c0_34] : memref<1x2x1x16xf32, #tpu.memory_space<vmem>>, vector<1x1x1x16xf32>
    %48 = vector.shape_cast %47 : vector<1x1x1x16xf32> to vector<1x16xf32>
    %49 = vector.shape_cast %48 : vector<1x16xf32> to vector<1x1x16xf32>
    %50 = vector.broadcast %49 : vector<1x1x16xf32> to vector<4x8x16xf32>
    %51 = arith.addf %46, %50 : vector<4x8x16xf32>
    %cst_35 = arith.constant 2.500000e-01 : f32
    %52 = vector.broadcast %cst_35 : f32 to vector<4x8x16xf32>
    %53 = arith.mulf %51, %52 : vector<4x8x16xf32>
    %54 = vector.shape_cast %42 : vector<32x16xf32> to vector<4x8x16xf32>
    %c0_36 = arith.constant 0 : index
    %c0_37 = arith.constant 0 : index
    %c0_38 = arith.constant 0 : index
    %c0_39 = arith.constant 0 : index
    %55 = vector.load %arg12[%c0_36, %c0_37, %c0_38, %c0_39] : memref<1x2x1x16xf32, #tpu.memory_space<vmem>>, vector<1x1x1x16xf32>
    %56 = vector.shape_cast %55 : vector<1x1x1x16xf32> to vector<1x16xf32>
    %57 = vector.shape_cast %56 : vector<1x16xf32> to vector<1x1x16xf32>
    %58 = vector.broadcast %57 : vector<1x1x16xf32> to vector<4x8x16xf32>
    %59 = arith.addf %54, %58 : vector<4x8x16xf32>
    %60 = vector.shape_cast %45 : vector<32x16xf32> to vector<4x8x16xf32>
    %c0_40 = arith.constant 0 : index
    %c0_41 = arith.constant 0 : index
    %c0_42 = arith.constant 0 : index
    %c0_43 = arith.constant 0 : index
    %61 = vector.load %arg14[%c0_40, %c0_41, %c0_42, %c0_43] : memref<1x2x1x16xf32, #tpu.memory_space<vmem>>, vector<1x1x1x16xf32>
    %62 = vector.shape_cast %61 : vector<1x1x1x16xf32> to vector<1x16xf32>
    %63 = vector.shape_cast %62 : vector<1x16xf32> to vector<1x1x16xf32>
    %64 = vector.broadcast %63 : vector<1x1x16xf32> to vector<4x8x16xf32>
    %65 = arith.addf %60, %64 : vector<4x8x16xf32>
    %66 = arith.truncf %53 : vector<4x8x16xf32> to vector<4x8x16xbf16>
    %67 = arith.truncf %59 : vector<4x8x16xf32> to vector<4x8x16xbf16>
    "tpu.trace_start"() <{level = 10 : i32, message = "bqd,bkd->bqk"}> : () -> ()
    %cst_44 = arith.constant dense<0.000000e+00> : vector<4x8x8xf32>
    %68 = tpu.matmul %66, %67, %cst_44 {dimension_numbers = #tpu.dot_dimension_numbers<[2], [2], [1], [1], [0, 0, 0, 1, 1, 1], [0], [0]>} : vector<4x8x16xbf16>, vector<4x8x16xbf16>, vector<4x8x8xf32> -> vector<4x8x8xf32>
    "tpu.trace_stop"() : () -> ()
    %69 = vector.broadcast %10 : vector<1x1x8xf32> to vector<4x8x8xf32>
    %70 = arith.addf %68, %69 : vector<4x8x8xf32>
    %cst_45 = arith.constant dense<0xFF800000> : vector<4x8xf32>
    %71 = vector.multi_reduction <maximumf>, %70, %cst_45 [2] : vector<4x8x8xf32> to vector<4x8xf32>
    %72 = vector.shape_cast %71 : vector<4x8xf32> to vector<4x8x1xf32>
    %73 = vector.broadcast %72 : vector<4x8x1xf32> to vector<4x8x8xf32>
    %74 = arith.subf %70, %73 : vector<4x8x8xf32>
    %75 = math.exp %74 : vector<4x8x8xf32>
    %cst_46 = arith.constant dense<0.000000e+00> : vector<4x8xf32>
    %76 = vector.multi_reduction <add>, %75, %cst_46 [2] : vector<4x8x8xf32> to vector<4x8xf32>
    %77 = vector.shape_cast %76 : vector<4x8xf32> to vector<4x8x1xf32>
    %78 = vector.broadcast %77 : vector<4x8x1xf32> to vector<4x8x8xf32>
    %79 = arith.divf %75, %78 : vector<4x8x8xf32>
    %80 = arith.truncf %79 : vector<4x8x8xf32> to vector<4x8x8xbf16>
    %81 = arith.truncf %65 : vector<4x8x16xf32> to vector<4x8x16xbf16>
    "tpu.trace_start"() <{level = 10 : i32, message = "bqk,bkd->bqd"}> : () -> ()
    %cst_47 = arith.constant dense<0.000000e+00> : vector<4x8x16xf32>
    %82 = tpu.matmul %80, %81, %cst_47 {dimension_numbers = #tpu.dot_dimension_numbers<[2], [1], [1], [2], [0, 0, 0, 1, 1, 2], [0], [0]>} : vector<4x8x8xbf16>, vector<4x8x16xbf16>, vector<4x8x16xf32> -> vector<4x8x16xf32>
    "tpu.trace_stop"() : () -> ()
    %83 = vector.shape_cast %82 : vector<4x8x16xf32> to vector<32x16xf32>
    %84 = arith.truncf %83 : vector<32x16xf32> to vector<32x16xbf16>
    %c0_48 = arith.constant 0 : index
    %c0_49 = arith.constant 0 : index
    %c0_50 = arith.constant 0 : index
    %c0_51 = arith.constant 0 : index
    %85 = vector.load %arg15[%c0_48, %c0_49, %c0_50, %c0_51] : memref<1x2x16x32xbf16, #tpu.memory_space<vmem>>, vector<1x1x16x32xbf16>
    %86 = vector.shape_cast %85 : vector<1x1x16x32xbf16> to vector<16x32xbf16>
    %cst_52 = arith.constant dense<0.000000e+00> : vector<32x32xf32>
    %87 = tpu.matmul %84, %86, %cst_52 {dimension_numbers = #tpu.dot_dimension_numbers<[1], [0], [0], [1], [0, 0, 1, 1], [], []>} : vector<32x16xbf16>, vector<16x32xbf16>, vector<32x32xf32> -> vector<32x32xf32>
    %88 = arith.addf %36, %87 : vector<32x32xf32>
    %c0_53 = arith.constant 0 : index
    %c1 = arith.constant 1 : index
    %c0_54 = arith.constant 0 : index
    %c0_55 = arith.constant 0 : index
    %89 = vector.load %arg9[%c0_53, %c1, %c0_54, %c0_55] : memref<1x2x32x16xbf16, #tpu.memory_space<vmem>>, vector<1x1x32x16xbf16>
    %90 = vector.shape_cast %89 : vector<1x1x32x16xbf16> to vector<32x16xbf16>
    %cst_56 = arith.constant dense<0.000000e+00> : vector<32x16xf32>
    %91 = tpu.matmul %35, %90, %cst_56 {dimension_numbers = #tpu.dot_dimension_numbers<[1], [0], [0], [1], [0, 0, 1, 1], [], []>} : vector<32x32xbf16>, vector<32x16xbf16>, vector<32x16xf32> -> vector<32x16xf32>
    %c0_57 = arith.constant 0 : index
    %c1_58 = arith.constant 1 : index
    %c0_59 = arith.constant 0 : index
    %c0_60 = arith.constant 0 : index
    %92 = vector.load %arg11[%c0_57, %c1_58, %c0_59, %c0_60] : memref<1x2x32x16xbf16, #tpu.memory_space<vmem>>, vector<1x1x32x16xbf16>
    %93 = vector.shape_cast %92 : vector<1x1x32x16xbf16> to vector<32x16xbf16>
    %cst_61 = arith.constant dense<0.000000e+00> : vector<32x16xf32>
    %94 = tpu.matmul %35, %93, %cst_61 {dimension_numbers = #tpu.dot_dimension_numbers<[1], [0], [0], [1], [0, 0, 1, 1], [], []>} : vector<32x32xbf16>, vector<32x16xbf16>, vector<32x16xf32> -> vector<32x16xf32>
    %c0_62 = arith.constant 0 : index
    %c1_63 = arith.constant 1 : index
    %c0_64 = arith.constant 0 : index
    %c0_65 = arith.constant 0 : index
    %95 = vector.load %arg13[%c0_62, %c1_63, %c0_64, %c0_65] : memref<1x2x32x16xbf16, #tpu.memory_space<vmem>>, vector<1x1x32x16xbf16>
    %96 = vector.shape_cast %95 : vector<1x1x32x16xbf16> to vector<32x16xbf16>
    %cst_66 = arith.constant dense<0.000000e+00> : vector<32x16xf32>
    %97 = tpu.matmul %35, %96, %cst_66 {dimension_numbers = #tpu.dot_dimension_numbers<[1], [0], [0], [1], [0, 0, 1, 1], [], []>} : vector<32x32xbf16>, vector<32x16xbf16>, vector<32x16xf32> -> vector<32x16xf32>
    %98 = vector.shape_cast %91 : vector<32x16xf32> to vector<4x8x16xf32>
    %c0_67 = arith.constant 0 : index
    %c1_68 = arith.constant 1 : index
    %c0_69 = arith.constant 0 : index
    %c0_70 = arith.constant 0 : index
    %99 = vector.load %arg10[%c0_67, %c1_68, %c0_69, %c0_70] : memref<1x2x1x16xf32, #tpu.memory_space<vmem>>, vector<1x1x1x16xf32>
    %100 = vector.shape_cast %99 : vector<1x1x1x16xf32> to vector<1x16xf32>
    %101 = vector.shape_cast %100 : vector<1x16xf32> to vector<1x1x16xf32>
    %102 = vector.broadcast %101 : vector<1x1x16xf32> to vector<4x8x16xf32>
    %103 = arith.addf %98, %102 : vector<4x8x16xf32>
    %cst_71 = arith.constant 2.500000e-01 : f32
    %104 = vector.broadcast %cst_71 : f32 to vector<4x8x16xf32>
    %105 = arith.mulf %103, %104 : vector<4x8x16xf32>
    %106 = vector.shape_cast %94 : vector<32x16xf32> to vector<4x8x16xf32>
    %c0_72 = arith.constant 0 : index
    %c1_73 = arith.constant 1 : index
    %c0_74 = arith.constant 0 : index
    %c0_75 = arith.constant 0 : index
    %107 = vector.load %arg12[%c0_72, %c1_73, %c0_74, %c0_75] : memref<1x2x1x16xf32, #tpu.memory_space<vmem>>, vector<1x1x1x16xf32>
    %108 = vector.shape_cast %107 : vector<1x1x1x16xf32> to vector<1x16xf32>
    %109 = vector.shape_cast %108 : vector<1x16xf32> to vector<1x1x16xf32>
    %110 = vector.broadcast %109 : vector<1x1x16xf32> to vector<4x8x16xf32>
    %111 = arith.addf %106, %110 : vector<4x8x16xf32>
    %112 = vector.shape_cast %97 : vector<32x16xf32> to vector<4x8x16xf32>
    %c0_76 = arith.constant 0 : index
    %c1_77 = arith.constant 1 : index
    %c0_78 = arith.constant 0 : index
    %c0_79 = arith.constant 0 : index
    %113 = vector.load %arg14[%c0_76, %c1_77, %c0_78, %c0_79] : memref<1x2x1x16xf32, #tpu.memory_space<vmem>>, vector<1x1x1x16xf32>
    %114 = vector.shape_cast %113 : vector<1x1x1x16xf32> to vector<1x16xf32>
    %115 = vector.shape_cast %114 : vector<1x16xf32> to vector<1x1x16xf32>
    %116 = vector.broadcast %115 : vector<1x1x16xf32> to vector<4x8x16xf32>
    %117 = arith.addf %112, %116 : vector<4x8x16xf32>
    %118 = arith.truncf %105 : vector<4x8x16xf32> to vector<4x8x16xbf16>
    %119 = arith.truncf %111 : vector<4x8x16xf32> to vector<4x8x16xbf16>
    "tpu.trace_start"() <{level = 10 : i32, message = "bqd,bkd->bqk"}> : () -> ()
    %cst_80 = arith.constant dense<0.000000e+00> : vector<4x8x8xf32>
    %120 = tpu.matmul %118, %119, %cst_80 {dimension_numbers = #tpu.dot_dimension_numbers<[2], [2], [1], [1], [0, 0, 0, 1, 1, 1], [0], [0]>} : vector<4x8x16xbf16>, vector<4x8x16xbf16>, vector<4x8x8xf32> -> vector<4x8x8xf32>
    "tpu.trace_stop"() : () -> ()
    %121 = vector.broadcast %10 : vector<1x1x8xf32> to vector<4x8x8xf32>
    %122 = arith.addf %120, %121 : vector<4x8x8xf32>
    %cst_81 = arith.constant dense<0xFF800000> : vector<4x8xf32>
    %123 = vector.multi_reduction <maximumf>, %122, %cst_81 [2] : vector<4x8x8xf32> to vector<4x8xf32>
    %124 = vector.shape_cast %123 : vector<4x8xf32> to vector<4x8x1xf32>
    %125 = vector.broadcast %124 : vector<4x8x1xf32> to vector<4x8x8xf32>
    %126 = arith.subf %122, %125 : vector<4x8x8xf32>
    %127 = math.exp %126 : vector<4x8x8xf32>
    %cst_82 = arith.constant dense<0.000000e+00> : vector<4x8xf32>
    %128 = vector.multi_reduction <add>, %127, %cst_82 [2] : vector<4x8x8xf32> to vector<4x8xf32>
    %129 = vector.shape_cast %128 : vector<4x8xf32> to vector<4x8x1xf32>
    %130 = vector.broadcast %129 : vector<4x8x1xf32> to vector<4x8x8xf32>
    %131 = arith.divf %127, %130 : vector<4x8x8xf32>
    %132 = arith.truncf %131 : vector<4x8x8xf32> to vector<4x8x8xbf16>
    %133 = arith.truncf %117 : vector<4x8x16xf32> to vector<4x8x16xbf16>
    "tpu.trace_start"() <{level = 10 : i32, message = "bqk,bkd->bqd"}> : () -> ()
    %cst_83 = arith.constant dense<0.000000e+00> : vector<4x8x16xf32>
    %134 = tpu.matmul %132, %133, %cst_83 {dimension_numbers = #tpu.dot_dimension_numbers<[2], [1], [1], [2], [0, 0, 0, 1, 1, 2], [0], [0]>} : vector<4x8x8xbf16>, vector<4x8x16xbf16>, vector<4x8x16xf32> -> vector<4x8x16xf32>
    "tpu.trace_stop"() : () -> ()
    %135 = vector.shape_cast %134 : vector<4x8x16xf32> to vector<32x16xf32>
    %136 = arith.truncf %135 : vector<32x16xf32> to vector<32x16xbf16>
    %c0_84 = arith.constant 0 : index
    %c1_85 = arith.constant 1 : index
    %c0_86 = arith.constant 0 : index
    %c0_87 = arith.constant 0 : index
    %137 = vector.load %arg15[%c0_84, %c1_85, %c0_86, %c0_87] : memref<1x2x16x32xbf16, #tpu.memory_space<vmem>>, vector<1x1x16x32xbf16>
    %138 = vector.shape_cast %137 : vector<1x1x16x32xbf16> to vector<16x32xbf16>
    %cst_88 = arith.constant dense<0.000000e+00> : vector<32x32xf32>
    %139 = tpu.matmul %136, %138, %cst_88 {dimension_numbers = #tpu.dot_dimension_numbers<[1], [0], [0], [1], [0, 0, 1, 1], [], []>} : vector<32x16xbf16>, vector<16x32xbf16>, vector<32x32xf32> -> vector<32x32xf32>
    %140 = arith.addf %88, %139 : vector<32x32xf32>
    %c0_89 = arith.constant 0 : index
    %c0_90 = arith.constant 0 : index
    %c0_91 = arith.constant 0 : index
    %141 = vector.load %arg17[%c0_89, %c0_90, %c0_91] : memref<1x1x32xf32, #tpu.memory_space<vmem>>, vector<1x1x32xf32>
    %142 = vector.shape_cast %141 : vector<1x1x32xf32> to vector<1x32xf32>
    %c0_92 = arith.constant 0 : index
    %c0_93 = arith.constant 0 : index
    %c0_94 = arith.constant 0 : index
    %143 = vector.load %arg16[%c0_92, %c0_93, %c0_94] : memref<1x1x32xf32, #tpu.memory_space<vmem>>, vector<1x1x32xf32>
    %144 = vector.shape_cast %143 : vector<1x1x32xf32> to vector<1x32xf32>
    %145 = vector.broadcast %144 : vector<1x32xf32> to vector<32x32xf32>
    %146 = arith.addf %140, %145 : vector<32x32xf32>
    %147 = vector.broadcast %142 : vector<1x32xf32> to vector<32x32xf32>
    %148 = arith.mulf %147, %146 : vector<32x32xf32>
    %149 = arith.addf %4, %148 : vector<32x32xf32>
    %c0_95 = arith.constant 0 : index
    %c0_96 = arith.constant 0 : index
    %c0_97 = arith.constant 0 : index
    %150 = vector.load %arg18[%c0_95, %c0_96, %c0_97] : memref<1x1x32xf32, #tpu.memory_space<vmem>>, vector<1x1x32xf32>
    %151 = vector.shape_cast %150 : vector<1x1x32xf32> to vector<1x32xf32>
    %c0_98 = arith.constant 0 : index
    %c0_99 = arith.constant 0 : index
    %c0_100 = arith.constant 0 : index
    %152 = vector.load %arg19[%c0_98, %c0_99, %c0_100] : memref<1x1x32xf32, #tpu.memory_space<vmem>>, vector<1x1x32xf32>
    %153 = vector.shape_cast %152 : vector<1x1x32xf32> to vector<1x32xf32>
    %cst_101 = arith.constant dense<0.000000e+00> : vector<32xf32>
    %154 = vector.multi_reduction <add>, %149, %cst_101 [1] : vector<32x32xf32> to vector<32xf32>
    %155 = vector.shape_cast %154 : vector<32xf32> to vector<32x1xf32>
    %cst_102 = arith.constant 3.200000e+01 : f32
    %156 = vector.broadcast %cst_102 : f32 to vector<32x1xf32>
    %157 = arith.divf %155, %156 : vector<32x1xf32>
    %158 = vector.broadcast %157 : vector<32x1xf32> to vector<32x32xf32>
    %159 = arith.subf %149, %158 : vector<32x32xf32>
    %160 = arith.mulf %159, %159 : vector<32x32xf32>
    %cst_103 = arith.constant dense<0.000000e+00> : vector<32xf32>
    %161 = vector.multi_reduction <add>, %160, %cst_103 [1] : vector<32x32xf32> to vector<32xf32>
    %162 = vector.shape_cast %161 : vector<32xf32> to vector<32x1xf32>
    %cst_104 = arith.constant 3.200000e+01 : f32
    %163 = vector.broadcast %cst_104 : f32 to vector<32x1xf32>
    %164 = arith.divf %162, %163 : vector<32x1xf32>
    %cst_105 = arith.constant 9.99999997E-7 : f32
    %165 = vector.broadcast %cst_105 : f32 to vector<32x1xf32>
    %166 = arith.addf %164, %165 : vector<32x1xf32>
    %167 = math.rsqrt %166 : vector<32x1xf32>
    %168 = vector.broadcast %167 : vector<32x1xf32> to vector<32x32xf32>
    %169 = arith.mulf %159, %168 : vector<32x32xf32>
    %170 = vector.broadcast %151 : vector<1x32xf32> to vector<32x32xf32>
    %171 = arith.mulf %169, %170 : vector<32x32xf32>
    %172 = vector.broadcast %153 : vector<1x32xf32> to vector<32x32xf32>
    %173 = arith.addf %171, %172 : vector<32x32xf32>
    %174 = arith.truncf %173 : vector<32x32xf32> to vector<32x32xbf16>
    %c0_106 = arith.constant 0 : index
    %c0_107 = arith.constant 0 : index
    %c0_108 = arith.constant 0 : index
    %175 = vector.load %arg20[%c0_106, %c0_107, %c0_108] : memref<1x32x128xbf16, #tpu.memory_space<vmem>>, vector<1x32x128xbf16>
    %176 = vector.shape_cast %175 : vector<1x32x128xbf16> to vector<32x128xbf16>
    %cst_109 = arith.constant dense<0.000000e+00> : vector<32x128xf32>
    %177 = tpu.matmul %174, %176, %cst_109 {dimension_numbers = #tpu.dot_dimension_numbers<[1], [0], [0], [1], [0, 0, 1, 1], [], []>} : vector<32x32xbf16>, vector<32x128xbf16>, vector<32x128xf32> -> vector<32x128xf32>
    %c0_110 = arith.constant 0 : index
    %c0_111 = arith.constant 0 : index
    %c0_112 = arith.constant 0 : index
    %178 = vector.load %arg21[%c0_110, %c0_111, %c0_112] : memref<1x1x128xf32, #tpu.memory_space<vmem>>, vector<1x1x128xf32>
    %179 = vector.shape_cast %178 : vector<1x1x128xf32> to vector<1x128xf32>
    %180 = vector.broadcast %179 : vector<1x128xf32> to vector<32x128xf32>
    %181 = arith.addf %177, %180 : vector<32x128xf32>
    %cst_113 = arith.constant 5.000000e-01 : f32
    %182 = vector.broadcast %cst_113 : f32 to vector<32x128xf32>
    %183 = arith.mulf %182, %181 : vector<32x128xf32>
    %cst_114 = arith.constant 0.707106769 : f32
    %184 = vector.broadcast %cst_114 : f32 to vector<32x128xf32>
    %185 = arith.mulf %181, %184 : vector<32x128xf32>
    %186 = math.erf %185 : vector<32x128xf32>
    %cst_115 = arith.constant 1.000000e+00 : f32
    %187 = vector.broadcast %cst_115 : f32 to vector<32x128xf32>
    %188 = arith.addf %187, %186 : vector<32x128xf32>
    %189 = arith.mulf %183, %188 : vector<32x128xf32>
    %190 = arith.truncf %189 : vector<32x128xf32> to vector<32x128xbf16>
    %c0_116 = arith.constant 0 : index
    %c0_117 = arith.constant 0 : index
    %c0_118 = arith.constant 0 : index
    %191 = vector.load %arg22[%c0_116, %c0_117, %c0_118] : memref<1x128x32xbf16, #tpu.memory_space<vmem>>, vector<1x128x32xbf16>
    %192 = vector.shape_cast %191 : vector<1x128x32xbf16> to vector<128x32xbf16>
    %cst_119 = arith.constant dense<0.000000e+00> : vector<32x32xf32>
    %193 = tpu.matmul %190, %192, %cst_119 {dimension_numbers = #tpu.dot_dimension_numbers<[1], [0], [0], [1], [0, 0, 1, 1], [], []>} : vector<32x128xbf16>, vector<128x32xbf16>, vector<32x32xf32> -> vector<32x32xf32>
    %c0_120 = arith.constant 0 : index
    %c0_121 = arith.constant 0 : index
    %c0_122 = arith.constant 0 : index
    %194 = vector.load %arg23[%c0_120, %c0_121, %c0_122] : memref<1x1x32xf32, #tpu.memory_space<vmem>>, vector<1x1x32xf32>
    %195 = vector.shape_cast %194 : vector<1x1x32xf32> to vector<1x32xf32>
    %196 = vector.broadcast %195 : vector<1x32xf32> to vector<32x32xf32>
    %197 = arith.addf %193, %196 : vector<32x32xf32>
    %c0_123 = arith.constant 0 : index
    %c0_124 = arith.constant 0 : index
    %c0_125 = arith.constant 0 : index
    %198 = vector.load %arg24[%c0_123, %c0_124, %c0_125] : memref<1x1x32xf32, #tpu.memory_space<vmem>>, vector<1x1x32xf32>
    %199 = vector.shape_cast %198 : vector<1x1x32xf32> to vector<1x32xf32>
    %200 = vector.broadcast %199 : vector<1x32xf32> to vector<32x32xf32>
    %201 = arith.mulf %200, %197 : vector<32x32xf32>
    %202 = arith.addf %149, %201 : vector<32x32xf32>
    %203 = vector.shape_cast %202 : vector<32x32xf32> to vector<4x8x32xf32>
    %c0_126 = arith.constant 0 : index
    %c0_127 = arith.constant 0 : index
    %c0_128 = arith.constant 0 : index
    %204 = vector.load %arg28[%c0_126, %c0_127, %c0_128] : memref<4x8x32xf32, #tpu.memory_space<vmem>>, vector<4x8x32xf32>
    tpu.vector_store %arg28[%c0_126, %c0_127, %c0_128], %203 {strides = array<i32>} : memref<4x8x32xf32, #tpu.memory_space<vmem>>, vector<4x8x32xf32>,
    %c1_i32 = arith.constant 1 : i32
    %205 = arith.cmpi eq, %arg1, %c1_i32 : i32
    %206 = arith.extui %205 : i1 to i32
    %c0_i32_129 = arith.constant 0 : i32
    %207 = arith.cmpi ne, %206, %c0_i32_129 : i32
    scf.if %207 {
      %208 = vector.shape_cast %202 : vector<32x32xf32> to vector<4x8x32xf32>
      %209 = vector.extract_strided_slice %208 {offsets = [0, 0, 0], sizes = [4, 1, 32], strides = [1, 1, 1]} : vector<4x8x32xf32> to vector<4x1x32xf32>
      %210 = vector.shape_cast %209 : vector<4x1x32xf32> to vector<4x32xf32>
      %c0_130 = arith.constant 0 : index
      %c0_131 = arith.constant 0 : index
      %211 = vector.load %arg25[%c0_130, %c0_131] : memref<1x32xf32, #tpu.memory_space<vmem>>, vector<1x32xf32>
      %c0_132 = arith.constant 0 : index
      %c0_133 = arith.constant 0 : index
      %212 = vector.load %arg26[%c0_132, %c0_133] : memref<1x32xf32, #tpu.memory_space<vmem>>, vector<1x32xf32>
      %cst_134 = arith.constant dense<0.000000e+00> : vector<4xf32>
      %213 = vector.multi_reduction <add>, %210, %cst_134 [1] : vector<4x32xf32> to vector<4xf32>
      %214 = vector.shape_cast %213 : vector<4xf32> to vector<4x1xf32>
      %cst_135 = arith.constant 3.200000e+01 : f32
      %215 = vector.broadcast %cst_135 : f32 to vector<4x1xf32>
      %216 = arith.divf %214, %215 : vector<4x1xf32>
      %217 = vector.broadcast %216 : vector<4x1xf32> to vector<4x32xf32>
      %218 = arith.subf %210, %217 : vector<4x32xf32>
      %219 = arith.mulf %218, %218 : vector<4x32xf32>
      %cst_136 = arith.constant dense<0.000000e+00> : vector<4xf32>
      %220 = vector.multi_reduction <add>, %219, %cst_136 [1] : vector<4x32xf32> to vector<4xf32>
      %221 = vector.shape_cast %220 : vector<4xf32> to vector<4x1xf32>
      %cst_137 = arith.constant 3.200000e+01 : f32
      %222 = vector.broadcast %cst_137 : f32 to vector<4x1xf32>
      %223 = arith.divf %221, %222 : vector<4x1xf32>
      %cst_138 = arith.constant 9.99999997E-7 : f32
      %224 = vector.broadcast %cst_138 : f32 to vector<4x1xf32>
      %225 = arith.addf %223, %224 : vector<4x1xf32>
      %226 = math.rsqrt %225 : vector<4x1xf32>
      %227 = vector.broadcast %226 : vector<4x1xf32> to vector<4x32xf32>
      %228 = arith.mulf %218, %227 : vector<4x32xf32>
      %229 = vector.broadcast %211 : vector<1x32xf32> to vector<4x32xf32>
      %230 = arith.mulf %228, %229 : vector<4x32xf32>
      %231 = vector.broadcast %212 : vector<1x32xf32> to vector<4x32xf32>
      %232 = arith.addf %230, %231 : vector<4x32xf32>
      %c0_139 = arith.constant 0 : index
      %c0_140 = arith.constant 0 : index
      %c0_141 = arith.constant 0 : index
      %233 = vector.load %arg27[%c0_139, %c0_140, %c0_141] : memref<1x4x32xf32, #tpu.memory_space<vmem>>, vector<1x4x32xf32>
      %234 = vector.shape_cast %233 : vector<1x4x32xf32> to vector<4x32xf32>
      %235 = vector.shape_cast %232 : vector<4x32xf32> to vector<1x4x32xf32>
      tpu.vector_store %arg27[%c0_139, %c0_140, %c0_141], %235 {strides = array<i32>} : memref<1x4x32xf32, #tpu.memory_space<vmem>>, vector<1x4x32xf32>,
    } else {
    }
    return
  }
  func.func @transform_0(%arg0: i32, %arg1: i32) -> (i32, i32) {
    %c0_i32 = arith.constant 0 : i32
    %c0_i32_0 = arith.constant 0 : i32
    return %arg0, %c0_i32 : i32, i32
  }
  func.func @transform_1(%arg0: i32, %arg1: i32) -> (i32, i32) {
    %c0_i32 = arith.constant 0 : i32
    %c0_i32_0 = arith.constant 0 : i32
    %c0_i32_1 = arith.constant 0 : i32
    return %c0_i32, %c0_i32_0 : i32, i32
  }
  func.func @transform_2(%arg0: i32, %arg1: i32) -> (i32, i32) {
    %c0_i32 = arith.constant 0 : i32
    %c0_i32_0 = arith.constant 0 : i32
    %c0_i32_1 = arith.constant 0 : i32
    return %c0_i32, %c0_i32_0 : i32, i32
  }
  func.func @transform_3(%arg0: i32, %arg1: i32) -> (i32, i32) {
    %c0_i32 = arith.constant 0 : i32
    %c0_i32_0 = arith.constant 0 : i32
    %c0_i32_1 = arith.constant 0 : i32
    return %c0_i32, %c0_i32_0 : i32, i32
  }
  func.func @transform_4(%arg0: i32, %arg1: i32) -> (i32, i32) {
    %c0_i32 = arith.constant 0 : i32
    %c0_i32_0 = arith.constant 0 : i32
    %c0_i32_1 = arith.constant 0 : i32
    return %c0_i32, %c0_i32_0 : i32, i32
  }
  func.func @transform_5(%arg0: i32, %arg1: i32) -> (i32, i32, i32) {
    %c0_i32 = arith.constant 0 : i32
    %c0_i32_0 = arith.constant 0 : i32
    %c0_i32_1 = arith.constant 0 : i32
    return %arg1, %c0_i32, %c0_i32_0 : i32, i32, i32
  }
  func.func @transform_6(%arg0: i32, %arg1: i32) -> (i32, i32, i32) {
    %c0_i32 = arith.constant 0 : i32
    %c0_i32_0 = arith.constant 0 : i32
    %c0_i32_1 = arith.constant 0 : i32
    return %arg1, %c0_i32, %c0_i32_0 : i32, i32, i32
  }
  func.func @transform_7(%arg0: i32, %arg1: i32) -> (i32, i32, i32, i32) {
    %c0_i32 = arith.constant 0 : i32
    %c0_i32_0 = arith.constant 0 : i32
    %c0_i32_1 = arith.constant 0 : i32
    %c0_i32_2 = arith.constant 0 : i32
    return %arg1, %c0_i32, %c0_i32_0, %c0_i32_1 : i32, i32, i32, i32
  }
  func.func @transform_8(%arg0: i32, %arg1: i32) -> (i32, i32, i32, i32) {
    %c0_i32 = arith.constant 0 : i32
    %c0_i32_0 = arith.constant 0 : i32
    %c0_i32_1 = arith.constant 0 : i32
    %c0_i32_2 = arith.constant 0 : i32
    return %arg1, %c0_i32, %c0_i32_0, %c0_i32_1 : i32, i32, i32, i32
  }
  func.func @transform_9(%arg0: i32, %arg1: i32) -> (i32, i32, i32, i32) {
    %c0_i32 = arith.constant 0 : i32
    %c0_i32_0 = arith.constant 0 : i32
    %c0_i32_1 = arith.constant 0 : i32
    %c0_i32_2 = arith.constant 0 : i32
    return %arg1, %c0_i32, %c0_i32_0, %c0_i32_1 : i32, i32, i32, i32
  }
  func.func @transform_10(%arg0: i32, %arg1: i32) -> (i32, i32, i32, i32) {
    %c0_i32 = arith.constant 0 : i32
    %c0_i32_0 = arith.constant 0 : i32
    %c0_i32_1 = arith.constant 0 : i32
    %c0_i32_2 = arith.constant 0 : i32
    return %arg1, %c0_i32, %c0_i32_0, %c0_i32_1 : i32, i32, i32, i32
  }
  func.func @transform_11(%arg0: i32, %arg1: i32) -> (i32, i32, i32, i32) {
    %c0_i32 = arith.constant 0 : i32
    %c0_i32_0 = arith.constant 0 : i32
    %c0_i32_1 = arith.constant 0 : i32
    %c0_i32_2 = arith.constant 0 : i32
    return %arg1, %c0_i32, %c0_i32_0, %c0_i32_1 : i32, i32, i32, i32
  }
  func.func @transform_12(%arg0: i32, %arg1: i32) -> (i32, i32, i32, i32) {
    %c0_i32 = arith.constant 0 : i32
    %c0_i32_0 = arith.constant 0 : i32
    %c0_i32_1 = arith.constant 0 : i32
    %c0_i32_2 = arith.constant 0 : i32
    return %arg1, %c0_i32, %c0_i32_0, %c0_i32_1 : i32, i32, i32, i32
  }
  func.func @transform_13(%arg0: i32, %arg1: i32) -> (i32, i32, i32, i32) {
    %c0_i32 = arith.constant 0 : i32
    %c0_i32_0 = arith.constant 0 : i32
    %c0_i32_1 = arith.constant 0 : i32
    %c0_i32_2 = arith.constant 0 : i32
    return %arg1, %c0_i32, %c0_i32_0, %c0_i32_1 : i32, i32, i32, i32
  }
  func.func @transform_14(%arg0: i32, %arg1: i32) -> (i32, i32, i32) {
    %c0_i32 = arith.constant 0 : i32
    %c0_i32_0 = arith.constant 0 : i32
    %c0_i32_1 = arith.constant 0 : i32
    return %arg1, %c0_i32, %c0_i32_0 : i32, i32, i32
  }
  func.func @transform_15(%arg0: i32, %arg1: i32) -> (i32, i32, i32) {
    %c0_i32 = arith.constant 0 : i32
    %c0_i32_0 = arith.constant 0 : i32
    %c0_i32_1 = arith.constant 0 : i32
    return %arg1, %c0_i32, %c0_i32_0 : i32, i32, i32
  }
  func.func @transform_16(%arg0: i32, %arg1: i32) -> (i32, i32, i32) {
    %c0_i32 = arith.constant 0 : i32
    %c0_i32_0 = arith.constant 0 : i32
    %c0_i32_1 = arith.constant 0 : i32
    return %arg1, %c0_i32, %c0_i32_0 : i32, i32, i32
  }
  func.func @transform_17(%arg0: i32, %arg1: i32) -> (i32, i32, i32) {
    %c0_i32 = arith.constant 0 : i32
    %c0_i32_0 = arith.constant 0 : i32
    %c0_i32_1 = arith.constant 0 : i32
    return %arg1, %c0_i32, %c0_i32_0 : i32, i32, i32
  }
  func.func @transform_18(%arg0: i32, %arg1: i32) -> (i32, i32, i32) {
    %c0_i32 = arith.constant 0 : i32
    %c0_i32_0 = arith.constant 0 : i32
    %c0_i32_1 = arith.constant 0 : i32
    return %arg1, %c0_i32, %c0_i32_0 : i32, i32, i32
  }
  func.func @transform_19(%arg0: i32, %arg1: i32) -> (i32, i32, i32) {
    %c0_i32 = arith.constant 0 : i32
    %c0_i32_0 = arith.constant 0 : i32
    %c0_i32_1 = arith.constant 0 : i32
    return %arg1, %c0_i32, %c0_i32_0 : i32, i32, i32
  }
  func.func @transform_20(%arg0: i32, %arg1: i32) -> (i32, i32, i32) {
    %c0_i32 = arith.constant 0 : i32
    %c0_i32_0 = arith.constant 0 : i32
    %c0_i32_1 = arith.constant 0 : i32
    return %arg1, %c0_i32, %c0_i32_0 : i32, i32, i32
  }
  func.func @transform_21(%arg0: i32, %arg1: i32) -> (i32, i32, i32) {
    %c0_i32 = arith.constant 0 : i32
    %c0_i32_0 = arith.constant 0 : i32
    %c0_i32_1 = arith.constant 0 : i32
    return %arg1, %c0_i32, %c0_i32_0 : i32, i32, i32
  }
  func.func @transform_22(%arg0: i32, %arg1: i32) -> (i32, i32, i32) {
    %c0_i32 = arith.constant 0 : i32
    %c0_i32_0 = arith.constant 0 : i32
    %c0_i32_1 = arith.constant 0 : i32
    return %arg1, %c0_i32, %c0_i32_0 : i32, i32, i32
  }
  func.func @transform_23(%arg0: i32, %arg1: i32) -> (i32, i32) {
    %c0_i32 = arith.constant 0 : i32
    %c0_i32_0 = arith.constant 0 : i32
    %c0_i32_1 = arith.constant 0 : i32
    return %c0_i32, %c0_i32_0 : i32, i32
  }
  func.func @transform_24(%arg0: i32, %arg1: i32) -> (i32, i32) {
    %c0_i32 = arith.constant 0 : i32
    %c0_i32_0 = arith.constant 0 : i32
    %c0_i32_1 = arith.constant 0 : i32
    return %c0_i32, %c0_i32_0 : i32, i32
  }
  func.func @transform_25(%arg0: i32, %arg1: i32) -> (i32, i32, i32) {
    %c0_i32 = arith.constant 0 : i32
    %c0_i32_0 = arith.constant 0 : i32
    %c0_i32_1 = arith.constant 0 : i32
    return %arg0, %c0_i32, %c0_i32_0 : i32, i32, i32
  }
}

</mosaic_0001>

<bundles_post_ra>
// kernel: dinov2_forward.1
= control target key start
LH: loop header
LB: loop body
LE: loop exit
PB: predicated region body
PF: predicated region fallthrough
CT: control target
= control target key end

     0   :  { %s5430_s0 = inlined_call_operand.vmem [shape: f32[32,588], index: 0, kind: input, shape index: {}]   ;;  %s5431_s1 = inlined_call_operand.vmem [shape: bf16[588,32], index: 1, kind: input, shape index: {}]   ;;  %s5432_s2 = inlined_call_operand.vmem [shape: f32[1,32], index: 2, kind: input, shape index: {}]   ;;  %s5433_s3 = inlined_call_operand.vmem [shape: f32[1,32], index: 3, kind: input, shape index: {}]   ;;  %s5434_s4 = inlined_call_operand.vmem [shape: f32[4,32], index: 4, kind: input, shape index: {}]   ;;  %s5435_s5 = inlined_call_operand.vmem [shape: f32[2,1,32], index: 5, kind: input, shape index: {}]   ;;  %s5436_s6 = inlined_call_operand.vmem [shape: f32[2,1,32], index: 6, kind: input, shape index: {}]   ;;  %s5437_s7 = inlined_call_operand.vmem [shape: bf16[2,2,32,16], index: 7, kind: input, shape index: {}]   ;;  %s5438_s8 = inlined_call_operand.vmem [shape: f32[2,2,1,16], index: 8, kind: input, shape index: {}]   ;;  %s5439_s9 = inlined_call_operand.vmem [shape: bf16[2,2,32,16], index: 9, kind: input, shape index: {}]   ;;  %s5440_s10 = inlined_call_operand.vmem [shape: f32[2,2,1,16], index: 10, kind: input, shape index: {}]   ;;  %s5441_s11 = inlined_call_operand.vmem [shape: bf16[2,2,32,16], index: 11, kind: input, shape index: {}]   ;;  %s5442_s12 = inlined_call_operand.vmem [shape: f32[2,2,1,16], index: 12, kind: input, shape index: {}]   ;;  %s5443_s13 = inlined_call_operand.vmem [shape: bf16[2,2,16,32], index: 13, kind: input, shape index: {}]   ;;  %s5444_s14 = inlined_call_operand.vmem [shape: f32[2,1,32], index: 14, kind: input, shape index: {}]   ;;  %s5445_s15 = inlined_call_operand.vmem [shape: f32[2,1,32], index: 15, kind: input, shape index: {}]   ;;  %s5446_s16 = inlined_call_operand.vmem [shape: f32[2,1,32], index: 16, kind: input, shape index: {}]   ;;  %s5447_s17 = inlined_call_operand.vmem [shape: f32[2,1,32], index: 17, kind: input, shape index: {}]   ;;  %s5448_s18 = inlined_call_operand.vmem [shape: bf16[2,32,128], index: 18, kind: input, shape index: {}]   ;;  %s5449_s19 = inlined_call_operand.vmem [shape: f32[2,1,128], index: 19, kind: input, shape index: {}]   ;;  %s5450_s20 = inlined_call_operand.vmem [shape: bf16[2,128,32], index: 20, kind: input, shape index: {}]   ;;  %s5451_s21 = inlined_call_operand.vmem [shape: f32[2,1,32], index: 21, kind: input, shape index: {}]   ;;  %s5452_s22 = inlined_call_operand.vmem [shape: f32[2,1,32], index: 22, kind: input, shape index: {}]   ;;  %s5453_s23 = inlined_call_operand.vmem [shape: f32[1,32], index: 23, kind: input, shape index: {}]   ;;  %s5454_s24 = inlined_call_operand.vmem [shape: f32[1,32], index: 24, kind: input, shape index: {}]   ;;  %s5455_s25 = inlined_call_operand.hbm [shape: f32[2,4,32], index: 25, kind: output, shape index: {}]  }
   0x1   :  { %5476 = sst [smem:[#allocation22_spill]] %s5430_s0 }
   0x2   :  { %5477 = sst [smem:[#allocation23_spill]] %s5431_s1 }
   0x3   :  { %5478 = sst [smem:[#allocation24_spill]] %s5432_s2 }
   0x4   :  { %5479 = sst [smem:[#allocation25_spill]] %s5433_s3 }
   0x5   :  { %5480 = sst [smem:[#allocation26_spill]] %s5434_s4 }
   0x6   :  { %5481 = sst [smem:[#allocation27_spill]] %s5435_s5 }
   0x7   :  { %5482 = sst [smem:[#allocation28_spill]] %s5436_s6 }
   0x8   :  { %5483 = sst [smem:[#allocation29_spill]] %s5437_s7 }
   0x9   :  { %5484 = sst [smem:[#allocation30_spill]] %s5438_s8 }
   0xa   :  { %5485 = sst [smem:[#allocation31_spill]] %s5439_s9 }
   0xb   :  { %5486 = sst [smem:[#allocation32_spill]] %s5440_s10 }
   0xc   :  { %5487 = sst [smem:[#allocation33_spill]] %s5441_s11 }
   0xd   :  { %5488 = sst [smem:[#allocation34_spill]] %s5442_s12 }
   0xe   :  { %5489 = sst [smem:[#allocation35_spill]] %s5443_s13 }
   0xf   :  { %5490 = sst [smem:[#allocation36_spill]] %s5447_s17 }
  0x10   :  { %5491 = sst [smem:[#allocation37_spill]] %s5448_s18 }
  0x11   :  { %5492 = sst [smem:[#allocation38_spill]] %s5451_s21 }
  0x12   :  { %5493 = sst [smem:[#allocation39_spill]] %s5452_s22 }
  0x13   :  { %5494 = sst [smem:[#allocation40_spill]] %s5453_s23 }
  0x14   :  { %5495 = sst [smem:[#allocation41_spill]] %s5454_s24 }
  0x15   :  { %5496 = sst [smem:[#allocation42_spill]] %s5455_s25 }
  0x16   :  { %30 = vsyncpa [#allocation4], 0 }
  0x17   :  { %32 = vsyncpa [#allocation4 + $0x1], 0  ;;  %s4752_s29 = smov 0   ;;  %s4754_s2 = smov 0  }
  0x18   :  { %s4756_s6 = smov 0   ;;  %s4758_s30 = smov 0  }
  0x19   :  { %s4760_s7 = smov 0   ;;  %s4762_s3 = smov 0  }
  0x1a   :  { %s4764_s26 = smov 0   ;;  %s4766_s1 = smov 0  }
  0x1b LB: > { %5497 = sst [smem:[#allocation6_spill]] %s4586_s29  ;;  %s3832_s8 = sadd.s32 4294967295, %s4614_s1   ;;  %s4614_s1 = sphi %s4766_s1, %s38_s1   ;;  %s4610_s26 = sphi %s4764_s26, %s5568_s26   ;;  %s4606_s3 = sphi %s4762_s3, %s5567_s3   ;;  %s4602_s7 = sphi %s4760_s7, %s5566_s7   ;;  %s4598_s30 = sphi %s4758_s30, %s5565_s30   ;;  %s4594_s6 = sphi %s4756_s6, %s5564_s6   ;;  %s4590_s2 = sphi %s4754_s2, %s5563_s2   ;;  %s4586_s29 = sphi %s4752_s29, %s5562_s29  }
  0x1c   : > { %5498 = sst [smem:[#allocation7_spill]] %s4590_s2  ;;  %s3833_s27 = sadd.s32 4294967294, %s4614_s1  }
  0x1d   : > { %5499 = sst [smem:[#allocation8_spill]] %s4594_s6  ;;  %s47_s4 = sadd.s32 1, %s4606_s3 }
  0x1e   : > { %5500 = sst [smem:[#allocation9_spill]] %s4598_s30  ;;  %p48_p0 = scmp.ge.s32.totalorder %s47_s4, 2 }
  0x1f   : > { %5501 = sst [smem:[#allocation10_spill]] %s4602_s7  ;;  %s50_s28 = sadd.s32 1, %s4610_s26 }
  0x20   : > { %5502 = sst [smem:[#allocation11_spill]] %s4606_s3  ;;  %p687_p1 = scmp.ne.s32.totalorder %s4594_s6, %s4590_s2 }
  0x21   : > { %5503 = sst [smem:[#allocation12_spill]] %s4610_s26  ;;  %p688_p2 = scmp.eq.s32.totalorder %s3832_s8, 3 }
  0x22   : > { %5504 = sst [smem:[#allocation13_spill]] %s4614_s1  ;;  %s5570_s4 = smov (%p48_p0, %s47_s4), 0 }
  0x23   : > { %5505 = sst [smem:[#allocation14_spill]] %s5570_s4  ;;  %s5572_s28 = smov (!%p48_p0, %s50_s28), %s4610_s26 }
  0x24   : > { %p4801_p3 = por %p688_p2, %p687_p1  ;;  %p693_p4 = scmp.ne.s32.totalorder %s4590_s2, %s4586_s29 }
  0x25   : > { %p52_p5 = scmp.ge.s32.totalorder %s5572_s28, 2  ;;  %p694_p6 = scmp.eq.s32.totalorder %s3833_s27, 3 }
  0x26   : > { %s5506_s9 = scalar_select %p4801_p3, 1, 0 }
  0x27   : > { %p3836_p7 = scmp.ge.s32.totalorder %s4614_s1, 1  ;;  %p863_p8 = scmp.lt.s32.totalorder %s4614_s1, 5 }
  0x28   : > { %5507 = sst [smem:[#allocation15_spill]] %s5506_s9  ;;  %s5574_s28 = smov (%p52_p5, %s5572_s28), 0 }
  0x29   : > { %5508 = sst [smem:[#allocation16_spill]] %s5574_s28  ;;  %p4811_p9 = por %p694_p6, %p693_p4 }
  0x2a   : > { %p864_p10 = pnand %p3836_p7, %p863_p8  ;;  %s674_s0 = ssub.s32 %s4610_s26, %s5574_s28 }
  0x2b   : > { %s5509_s5 = scalar_select %p4811_p9, 1, 0 }
  0x2c   : > { %s677_s8 = sadd.s32 1, %s4594_s6  ;;  %p675_p11 = scmp.eq.s32.totalorder %s674_s0, 0 }
  0x2d   : > { %5510 = sst [smem:[#allocation17_spill]] %s5509_s5  ;;  %867 = sbr.rel (%p864_p10) target bundleno = 3630 (0xe2e), region = 120 }
  0x2e   : > { %s4819_s4 = scalar_select %p675_p11, %s4594_s6, %s677_s8  }
  0x30   : > { %5511 = sst [smem:[#allocation18_spill]] %s4819_s4 }
  0x32   : > { %s5463_s27 = sand.u32 1, %s4590_s2   ;;  %s3838_s3 = sshll.u32 %s4602_s7, 1 }
  0x33   : > { %s4825_s29 = sshll.u32 %s5463_s27, 2  ;;  %p1002_p12 = scmp.lt.s32.totalorder %s3838_s3, 3 }
  0x34   : > { %p1008_p13 = scmp.lt.s32.totalorder %s4598_s30, 1  ;;  %s5514_s7 = sld [smem:[#allocation22_spill]] }
  0x35   : > { %s5576_s3 = smov (!%p1002_p12, %s3838_s3), 3  ;;  %s5516_s4 = sld [smem:[#allocation30_spill]] }
  0x36   : > { %s4829_s5 = scalar_select %p1008_p13, %s4598_s30, 1 }
  0x37   : > { %s4322_s0 = smul.u32 40, %s5576_s3  ;;  %s5515_s3 = sld [smem:[#allocation29_spill]] }
  0x38   : > { %s3992_s23 = sshll.u32 %s4829_s5, 5  ;;  %s3842_s28 = sshll.u32 %s4829_s5, 1 }
  0x39   : > { %s5518_s2 = sld [smem:[#allocation31_spill]]  ;;  %s3995_s1 = sshll.u32 %s4829_s5, 4 }
  0x3a   : > { %s4842_s24 = scalar_lea.vmem %s5514_s7, %s4322_s0  ;;  %s5520_s10 = sld [smem:[#allocation32_spill]] }
  0x3b   : > { %s4854_s6 = scalar_lea.vmem %s5516_s4, %s3842_s28  ;;  %s5522_s11 = sld [smem:[#allocation33_spill]] }
  0x3c   : > { %5517 = sst [smem:[#allocation19_spill]] %s4854_s6 }
  0x3d   : > { %s4848_s21 = scalar_lea.vmem %s5515_s3, %s3992_s23  ;;  %s5523_s12 = sld [smem:[#allocation34_spill]] }
  0x3e   : > { %s5524_s13 = sld [smem:[#allocation35_spill]] }
  0x3f   : > { %s4859_s7 = scalar_lea.vmem %s5518_s2, %s3992_s23  ;;  %s5526_s18 = sld [smem:[#allocation37_spill]] }
  0x40   : > { %5519 = sst [smem:[#allocation20_spill]] %s4859_s7  ;;  %s4864_s22 = scalar_lea.vmem %s5520_s10, %s3842_s28 }
  0x41   : > { %5521 = sst [smem:[#allocation21_spill]] %s4864_s22  ;;  %s4869_s25 = scalar_lea.vmem %s5522_s11, %s3992_s23 }
  0x42   : > { %s3997_s10 = sshll.u32 %s4829_s5, 6  ;;  %s5527_s26 = sld [smem:[#allocation38_spill]] }
  0x43   : > { %s4874_s8 = scalar_lea.vmem %s5523_s12, %s3842_s28  ;;  %s4911_s23 = scalar_lea.vmem %s5450_s20, %s3997_s10 }
  0x44   : > { %s4880_s6 = scalar_lea.vmem %s5524_s13, %s3995_s1  ;;  %s5528_s17 = sld [smem:[#allocation39_spill]] }
  0x45   : > { %s4901_s2 = scalar_lea.vmem %s5526_s18, %s3995_s1  ;;  %s1000_s1 = scalar_lea.vmem [#allocation3], %s4825_s29 }
  0x46   : > { %s5529_s27 = sld [smem:[#allocation9_spill]] }
  0x48   : > { %s1073_s28 = scalar_lea.vmem %s5527_s26, %s4829_s5 }
  0x4a   : > { %s1076_s12 = scalar_lea.vmem %s5528_s17, %s4829_s5 }
  0x4c   : > { %p3855_p0 = scmp.ne.s32.totalorder %s5529_s27, 0 }
  0x4d   : > { %s5530_s0 = sld [smem:[#allocation23_spill]] (!%p3855_p0) }
  0x4e   : > { %1081 = sbr.rel (%p3855_p0) target bundleno = 339 (0x153), region = 124  ;;  %s5531_s3 = sld [smem:[#allocation25_spill]] (!%p3855_p0) }
  0x4f   : > { %s5532_s27 = sld [smem:[#allocation24_spill]] (!%p3855_p0) }
  0x50   : > { %s5533_s7 = sld [smem:[#allocation26_spill]] (!%p3855_p0) }
  0x53   : > { %v4399_v0 = vld [vmem:[%s5530_s0 + $0x78] sm:$0xff]   ;;  %vm1559_vm0 = vcmask 256000   ;;  %v4616_v3 = vmov 0.0   ;;  %v4403_v5 = vld [vmem:[%s5530_s0 + $0x70] sm:$0xff]   ;;  %v4407_v9 = vld [vmem:[%s5530_s0 + $0x68] sm:$0xff]   ;;  %vm1403_vm1 = vcmask 1045504  }
  0x54   : > { %v4400_v1 = vld [vmem:[%s5530_s0 + $0x38] sm:$0xff]   ;;  %3998 = vmatprep.subr.bf16.mxu0 %v4399_v0  ;;  %1560 = vst.msk [vmem:[#allocation2 + $0x5] sm:$0x7] %vm1559_vm0, %v4616_v3  ;;  %1561 = vst.msk [vmem:[#allocation2 + $0xd] sm:$0x7] %vm1559_vm0, %v4616_v3  ;;  %v4404_v6 = vld [vmem:[%s5530_s0 + $0x30] sm:$0xff]  }
  0x55   : > { %v4401_v2 = vld [vmem:[%s5530_s0 + $0xf8] sm:$0xff]   ;;  %1562 = vst.msk [vmem:[#allocation2 + $0x15] sm:$0x7] %vm1559_vm0, %v4616_v3  ;;  %1563 = vst.msk [vmem:[#allocation2 + $0x1d] sm:$0x7] %vm1559_vm0, %v4616_v3  ;;  %3999 = vmatpush3.bf16.msra.mxu0 %v4400_v1  ;;  %v4405_v7 = vld [vmem:[%s5530_s0 + $0xf0] sm:$0xff]  }
  0x56   : > { %v4402_v4 = vld [vmem:[%s5530_s0 + $0xb8] sm:$0xff]   ;;  %4020 = vmatprep.subr.bf16.mxu1 %v4401_v2  ;;  %4000 = vmatprep.subr.bf16.mxu0 %v4403_v5  ;;  %v4406_v8 = vld [vmem:[%s5530_s0 + $0xb0] sm:$0xff]   ;;  %v4408_v10 = vld [vmem:[%s5530_s0 + $0x28] sm:$0xff]   ;;  %vm4617_vm2 = vmmov 0   ;;  %vm1399_vm3 = vcmask 621568   ;;  %vm1531_vm4 = vcmask 253952   ;;  %s5534_s10 = smov %s5533_s7 }
  0x57   : > { %4021 = vmatpush3.bf16.msra.mxu1 %v4402_v4  ;;  %v4409_v11 = vld [vmem:[%s5530_s0 + $0xe8] sm:$0xff]   ;;  %v4411_v13 = vld [vmem:[%s5530_s0 + $0x60] sm:$0xff]   ;;  %v4415_v17 = vld [vmem:[%s5530_s0 + $0x58] sm:$0xff]   ;;  %vm1538_vm5 = vcmask 257024   ;;  %vm1546_vm6 = vcmask 261124  }
  0x58   : > { %4022 = vmatprep.subr.bf16.mxu1 %v4405_v7  ;;  %v4410_v12 = vld [vmem:[%s5530_s0 + $0xa8] sm:$0xff]   ;;  %v4412_v14 = vld [vmem:[%s5530_s0 + $0x20] sm:$0xff]   ;;  %v4416_v18 = vld [vmem:[%s5530_s0 + $0x18] sm:$0xff]  }
  0x59   : > { %4001 = vmatpush3.bf16.msra.mxu0 %v4404_v6  ;;  %v4413_v15 = vld [vmem:[%s5530_s0 + $0xe0] sm:$0xff]   ;;  %v4417_v19 = vld [vmem:[%s5530_s0 + $0xd8] sm:$0xff]   ;;  %v4419_v21 = vld [vmem:[%s5530_s0 + $0x50] sm:$0xff]  }
  0x5a   : > { %4002 = vmatprep.subr.bf16.mxu0 %v4407_v9  ;;  %v4414_v16 = vld [vmem:[%s5530_s0 + $0xa0] sm:$0xff]   ;;  %v4418_v20 = vld [vmem:[%s5530_s0 + $0x98] sm:$0xff]   ;;  %v4420_v22 = vld [vmem:[%s5530_s0 + $0x10] sm:$0xff]  }
  0x5b   : > { %4023 = vmatpush3.bf16.msra.mxu1 %v4406_v8  ;;  %v4421_v23 = vld [vmem:[%s5530_s0 + $0xd0] sm:$0xff]   ;;  %v4423_v25 = vld [vmem:[%s5530_s0 + $0x48] sm:$0xff]   ;;  %v4427_v29 = vld [vmem:[%s5530_s0 + $0x40] sm:$0xff]  }
  0x5c   : > { %4024 = vmatprep.subr.bf16.mxu1 %v4409_v11  ;;  %v4422_v24 = vld [vmem:[%s5530_s0 + $0x90] sm:$0xff]   ;;  %v4424_v26 = vld [vmem:[%s5530_s0 + $0x8] sm:$0xff]   ;;  %v4428_v30 = vld [vmem:[%s5530_s0] sm:$0xff]  }
  0x5d   : > { %4003 = vmatpush3.bf16.msra.mxu0 %v4408_v10  ;;  %v4425_v27 = vld [vmem:[%s5530_s0 + $0xc8] sm:$0xff]   ;;  %v4429_v31 = vld [vmem:[%s5530_s0 + $0xc0] sm:$0xff]   ;;  %v1088_v33 = vld [vmem:[%s4842_s24 + $0x30] sm:$0xff] }
  0x5e   : > { %4004 = vmatprep.subr.bf16.mxu0 %v4411_v13  ;;  %v4426_v28 = vld [vmem:[%s5530_s0 + $0x88] sm:$0xff]   ;;  %v4430_v35 = vld [vmem:[%s5530_s0 + $0x80] sm:$0xff]   ;;  %v1085_v38 = vld [vmem:[%s4842_s24 + $0x18] sm:$0xff] }
  0x5f   : > { %4025 = vmatpush3.bf16.msra.mxu1 %v4410_v12  ;;  %v1083_v32 = vld [vmem:[%s4842_s24 + $0x8] sm:$0xff]  ;;  %v1082_v36 = vld [vmem:[%s4842_s24] sm:$0xff]  ;;  %v1084_v43 = vld [vmem:[%s4842_s24 + $0x10] sm:$0xff] }
  0x60   : > { %4026 = vmatprep.subr.bf16.mxu1 %v4413_v15  ;;  %v1093_v34 = vpack.c.bf16 %v1088_v33, %v1083_v32  ;;  %v1087_v37 = vld [vmem:[%s4842_s24 + $0x28] sm:$0xff]  ;;  %v1090_v39 = vld [vmem:[%s4842_s24 + $0x40] sm:$0xff]  ;;  %v1089_v44 = vld [vmem:[%s4842_s24 + $0x38] sm:$0xff] }
  0x61   : > { %4005 = vmatpush3.bf16.msra.mxu0 %v4412_v14  ;;  %v1092_v40 = vpack.c.bf16 %v1087_v37, %v1082_v36  ;;  %v1095_v41 = vpack.c.bf16 %v1090_v39, %v1085_v38  ;;  %v4431_v42 = vld [vmem:[%s5530_s0 + $0x120] sm:$0x3f]   ;;  %v1094_v46 = vpack.c.bf16 %v1089_v44, %v1084_v43  ;;  %v4432_v47 = vld [vmem:[%s5530_s0 + $0x118] sm:$0xff]   ;;  %v4433_v48 = vld [vmem:[%s5530_s0 + $0x110] sm:$0xff]  }
  0x62   : > { %4006 = vmatprep.subr.bf16.mxu0 %v4415_v17  ;;  %1439 = vmatprep.mubr.bf16.mxu0 %v1093_v34  ;;  %v1405_v45 = vsel %vm1403_vm1, %v4431_v42, 0  ;;  %v4434_v49 = vld [vmem:[%s5530_s0 + $0x108] sm:$0xff]   ;;  %v4435_v50 = vld [vmem:[%s5530_s0 + $0x100] sm:$0xff]  }
  0x63   : > { %4027 = vmatpush3.bf16.msra.mxu1 %v4414_v16  ;;  %1480 = vmatprep.mubr.bf16.mxu1 %v1095_v41  ;;  %v1086_v51 = vld [vmem:[%s4842_s24 + $0x20] sm:$0xff]  ;;  %v1091_v52 = vld [vmem:[%s4842_s24 + $0x48] sm:$0xff] }
  0x64   : > { %4028 = vmatprep.subr.bf16.mxu1 %v4417_v19  ;;  %v1096_v53 = vpack.c.bf16 %v1091_v52, %v1086_v51  ;;  %v1530_v54 = vld [vmem:[%s5531_s3] sm:$0x1] }
  0x65   : > { %4007 = vmatpush3.bf16.msra.mxu0 %v4416_v18  ;;  %1532 = vst.msk [vmem:[#allocation2] sm:$0x1] %vm1531_vm4, %v1530_v54  ;;  %1533 = vst.msk [vmem:[#allocation2 + $0x8] sm:$0x1] %vm1531_vm4, %v1530_v54  ;;  %v3856_v61 = vld [vmem:[%s5532_s27] ss:$0 sm:$0xff] }
  0x66   : > { %4008 = vmatprep.subr.bf16.mxu0 %v4419_v21  ;;  %1534 = vst.msk [vmem:[#allocation2 + $0x10] sm:$0x1] %vm1531_vm4, %v1530_v54  ;;  %1535 = vst.msk [vmem:[#allocation2 + $0x18] sm:$0x1] %vm1531_vm4, %v1530_v54  ;;  %v1540_v4 = vld [vmem:[%s5533_s7] sm:$0xf] }
  0x67   : > { %4029 = vmatpush3.bf16.msra.mxu1 %v4418_v20  ;;  %v1542_v8 = vrot.slane %v1540_v4, 4  ;;  %v1536_v10 = vld [vmem:[%s5534_s10] sm:$0xf] }
  0x68   : > { %4030 = vmatprep.subr.bf16.mxu1 %v4421_v23  ;;  %v1552_v11 = vld [vmem:[%s5534_s10] sm:$0xf] }
  0x69   : > { %4009 = vmatpush3.bf16.msra.mxu0 %v4420_v22  ;;  %v1554_v17 = vrot.slane %v1552_v11, 4  ;;  %v1548_v19 = vld [vmem:[%s5534_s10] sm:$0xf] }
  0x6a   : > { %4010 = vmatprep.subr.bf16.mxu0 %v4423_v25 }
  0x6b   : > { %4031 = vmatpush3.bf16.msra.mxu1 %v4422_v24 }
  0x6c   : > { %4032 = vmatprep.subr.bf16.mxu1 %v4425_v27 }
  0x6d   : > { %4011 = vmatpush3.bf16.msra.mxu0 %v4424_v26 }
  0x6e   : > { %4012 = vmatprep.subr.bf16.mxu0 %v4427_v29 }
  0x6f   : > { %4033 = vmatpush3.bf16.msra.mxu1 %v4426_v28 }
  0x70   : > { %4034 = vmatprep.subr.bf16.mxu1 %v4429_v31 }
  0x71   : > { %4013 = vmatpush3.bf16.msra.mxu0 %v4428_v30 }
  0x72   : > { %4124 = vmatprep.subr.bf16.mxu0 %v4616_v3 }
  0x73   : > { %4035 = vmatpush3.bf16.msra.mxu1 %v4430_v35 }
  0x74   : > { %1440 = vmatmul.mubr.bf16.vlgmr.msra.gmra.mxu0 %v1092_v40 }
  0x75   : > { %4125 = vmatpush3.bf16.msra.mxu0 %v1405_v45  ;;  %4134 = vmatprep.mubr.msk.bf16.mxu0 %vm4617_vm2, %v4616_v3 }
  0x76   : > { %1481 = vmatmul.mubr.bf16.vlgmr.msra.gmra.mxu1 %v1094_v46  ;;  %4126 = vmatprep.subr.bf16.mxu0 %v4616_v3 }
  0x79   : > { %4127 = vmatpush3.bf16.msra.mxu0 %v4432_v47 }
  0x7a   : > { %4128 = vmatprep.subr.bf16.mxu0 %v4616_v3 }
  0x7d   : > { %4129 = vmatpush3.bf16.msra.mxu0 %v4433_v48 }
  0x7e   : > { %4130 = vmatprep.subr.bf16.mxu0 %v4616_v3 }
  0x81   : > { %4131 = vmatpush3.bf16.msra.mxu0 %v4434_v49 }
  0x82   : > { %4132 = vmatprep.subr.bf16.mxu0 %v4616_v3 }
  0x85   : > { %4133 = vmatpush3.bf16.msra.mxu0 %v4435_v50 }
  0x88   : > { %4135 = vmatmul.mubr.msk.bf16.vlgmr.msra.gmra.mxu0 %vm1399_vm3, %v1096_v53 }
 0x134   : > { %v4014_v55 = vpop.f32.mrf.mxu0 }
 0x136   : > { %v4015_v56 = vpop.f32.mrf.mxu0  ;;  %v4036_v57 = vpop.f32.mrf.mxu1 }
 0x137   : > { %v4016_v60 = vadd.f32 %v4015_v56, %v4014_v55 }
 0x138   : > { %v4017_v58 = vpop.f32.mrf.mxu0  ;;  %v4037_v59 = vpop.f32.mrf.mxu1 }
 0x139   : > { %v1442_v0 = vadd.f32 %v4016_v60, %v3856_v61  ;;  %v4038_v1 = vadd.f32 %v4037_v59, %v4036_v57 }
 0x13a   : > { %v4018_v62 = vpop.f32.mrf.mxu0  ;;  %v4039_v63 = vpop.f32.mrf.mxu1 }
 0x13b   : > { %v4019_v2 = vadd.f32 %v4018_v62, %v4017_v58  ;;  %v1483_v7 = vadd.f32 %v4038_v1, %v1442_v0 }
 0x13c   : > { %v4040_v3 = vpop.f32.mrf.mxu1 }
 0x13d   : > { %v1445_v5 = vadd.f32 %v4019_v2, %v3856_v61  ;;  %v4041_v6 = vadd.f32 %v4040_v3, %v4039_v63 }
 0x13f   : > { %v1486_v16 = vadd.f32 %v4041_v6, %v1445_v5 }
 0x148   : > { %v1523_v9 = vpop.f32.mrf.mxu0 }
 0x149   : > { %v1524_v12 = vadd.f32 %v1523_v9, %v1483_v7 }
 0x14a   : > { %v4136_v13 = vpop.f32.mrf.mxu0 }
 0x14b   : > { %v1537_v14 = vadd.f32 %v1536_v10, %v1524_v12  ;;  %v1544_v15 = vadd.f32 %v1542_v8, %v1524_v12 }
 0x14c   : > { %v1526_v18 = vpop.f32.mrf.mxu0 }
 0x14d   : > { %1539 = vst.msk [vmem:[#allocation2 + $0x1] sm:$0xf] %vm1538_vm5, %v1537_v14  ;;  %v1527_v20 = vadd.f32 %v1526_v18, %v1486_v16 }
 0x14e   : > { %1547 = vst.msk [vmem:[#allocation2 + $0x5] sm:$0xf0] %vm1546_vm6, %v1544_v15  ;;  %v4137_v21 = vpop.f32.mrf.mxu0 }
 0x14f   : > { %v1549_v22 = vadd.f32 %v1548_v19, %v1527_v20  ;;  %v1556_v23 = vadd.f32 %v1554_v17, %v1527_v20 }
 0x151   : > { %1551 = vst.msk [vmem:[#allocation2 + $0x11] sm:$0xf] %vm1538_vm5, %v1549_v22 }
 0x152   : > { %1558 = vst.msk [vmem:[#allocation2 + $0x15] sm:$0xf0] %vm1546_vm6, %v1556_v23 }
 0x153 PF: > { %vm1574_vm7 = vcmask 261120   ;;  %s5535_s3 = sld [smem:[#allocation20_spill]]  ;;  %v4436_v52 = vld [vmem:[%s4848_s21 + $0x8] sm:$0xff]   ;;  %v4437_v53 = vld [vmem:[%s4848_s21] sm:$0xff]   ;;  %vm4619_vm8 = vmmov 0   ;;  %vm1896_vm9 = vcmask 130048   ;;  %s5543_s30 = scalar_lea.vmem %s5445_s15, %s4829_s5 }
 0x154   : > { %v1564_v24 = vld [vmem:[#allocation2] sm:$0xff]  ;;  %4138 = vmatprep.subr.bf16.mxu0 %v4436_v52  ;;  %s5536_s27 = sld [smem:[#allocation27_spill]]  ;;  %vm2137_vm10 = vcmask 1043456   ;;  %vm2081_vm12 = vcmask 64512   ;;  %s5544_s24 = scalar_lea.vmem %s5446_s16, %s4829_s5 }
 0x155   : > { %v1565_v26 = vld [vmem:[#allocation2 + $0x8] sm:$0xff]  ;;  %v1575_v27 = vsel %vm1574_vm7, %v1564_v24, 0.0  ;;  %4139 = vmatpush3.bf16.msra.mxu0 %v4436_v52  ;;  %s5538_s26 = sld [smem:[#allocation28_spill]] }
 0x156   : > { %1576 = vadd.xlane.f32.xlu0 %v1575_v27  ;;  %v1578_v30 = vsel %vm1574_vm7, %v1565_v26, 0.0  ;;  %4140 = vmatprep.subr.bf16.mxu0 %v4437_v53  ;;  %s5540_s17 = sld [smem:[#allocation21_spill]] }
 0x157   : > { %s5541_s18 = sld [smem:[#allocation19_spill]] }
 0x158   : > { %v1566_v25 = vld [vmem:[#allocation2 + $0x10] sm:$0xff] }
 0x159   : > { %v1581_v28 = vsel %vm1574_vm7, %v1566_v25, 0.0  ;;  %v1567_v29 = vld [vmem:[#allocation2 + $0x18] sm:$0xff]  ;;  %4141 = vmatpush3.bf16.msra.mxu0 %v4437_v53  ;;  %v4438_v54 = vld [vmem:[%s5535_s3 + $0x8] sm:$0xff]   ;;  %v4439_v23 = vld [vmem:[%s5535_s3] sm:$0xff]  }
 0x15a   : > { %1582 = vadd.xlane.f32.xlu1 %v1581_v28  ;;  %v1584_v31 = vsel %vm1574_vm7, %v1567_v29, 0.0  ;;  %1579 = vadd.xlane.f32.xlu0 %v1578_v30  ;;  %s5537_s13 = scalar_lea.vmem %s5536_s27, %s4829_s5 }
 0x15b   : > { %4146 = vmatprep.subr.bf16.mxu0 %v4438_v54  ;;  %v3895_v5 = vld [vmem:[%s5537_s13] ss:$0 sm:$0xff]  ;;  %s5539_s11 = scalar_lea.vmem %s5538_s26, %s4829_s5  ;;  %s5545_s13 = sld [smem:[#allocation36_spill]] }
 0x15c   : > { %v3896_v11 = vld [vmem:[%s5539_s11] ss:$0 sm:$0xff]  ;;  %s5547_s11 = scalar_lea.vmem %s5449_s19, %s4829_s5 }
 0x15e   : > { %1585 = vadd.xlane.f32.xlu1 %v1584_v31 }
 0x161   : > { %s5546_s9 = scalar_lea.vmem %s5545_s13, %s4829_s5 }
 0x1df   : > { %v1577_v32 = vpop.xlane.xlu0 %1576 }
 0x1e0   : > { %v1588_v34 = vmul.f32 0.03125, %v1577_v32  ;;  %v3910_v32 = vld [vmem:[%s5540_s17] ss:$0 sm:$0xff] }
 0x1e2   : > { %v1592_v36 = vsub.f32 %v1564_v24, %v1588_v34  ;;  %v4440_v24 = vld [vmem:[%s4869_s25 + $0x8] sm:$0xff]  }
 0x1e3   : > { %v1583_v33 = vpop.xlane.xlu1 %1582  ;;  %v1580_v38 = vpop.xlane.xlu0 %1579 }
 0x1e4   : > { %v1590_v35 = vmul.f32 0.03125, %v1583_v33  ;;  %v1589_v40 = vmul.f32 0.03125, %v1580_v38  ;;  %v1596_v42 = vmul.f32 %v1592_v36, %v1592_v36 }
 0x1e6   : > { %v1594_v37 = vsub.f32 %v1566_v25, %v1590_v35  ;;  %v1593_v44 = vsub.f32 %v1565_v26, %v1589_v40  ;;  %v1600_v46 = vsel %vm1574_vm7, %v1596_v42, 0.0  ;;  %v4441_v25 = vld [vmem:[%s4869_s25] sm:$0xff]   ;;  %v4618_v26 = vmov 0.0  }
 0x1e7   : > { %v1586_v39 = vpop.xlane.xlu1 %1585  ;;  %1601 = vadd.xlane.f32.xlu0 %v1600_v46  ;;  %4162 = vmatprep.subr.bf16.mxu1 %v4618_v26  ;;  %v3909_v35 = vld [vmem:[%s5541_s18] ss:$0 sm:$0xff] }
 0x1e8   : > { %v1591_v41 = vmul.f32 0.03125, %v1586_v39  ;;  %v1598_v43 = vmul.f32 %v1594_v37, %v1594_v37  ;;  %v1597_v48 = vmul.f32 %v1593_v44, %v1593_v44  ;;  %4164 = vmatprep.mubr.msk.bf16.mxu1 %vm4619_vm8, %v4618_v26  ;;  %v3911_v40 = vld [vmem:[%s4874_s8] ss:$0 sm:$0xff] }
 0x1ea   : > { %v1595_v45 = vsub.f32 %v1567_v29, %v1591_v41  ;;  %v1606_v47 = vsel %vm1574_vm7, %v1598_v43, 0.0  ;;  %v1603_v50 = vsel %vm1574_vm7, %v1597_v48, 0.0 }
 0x1eb   : > { %1607 = vadd.xlane.f32.xlu0 %v1606_v47  ;;  %1604 = vadd.xlane.f32.xlu1 %v1603_v50 }
 0x1ec   : > { %v1599_v49 = vmul.f32 %v1595_v45, %v1595_v45 }
 0x1ee   : > { %v1609_v51 = vsel %vm1574_vm7, %v1599_v49, 0.0 }
 0x1ef   : > { %1610 = vadd.xlane.f32.xlu1 %v1609_v51 }
 0x270   : > { %v1602_v55 = vpop.xlane.xlu0 %1601 }
 0x271   : > { %v1612_v56 = vmul.f32 0.03125, %v1602_v55 }
 0x273   : > { %v1616_v57 = vadd.f32 1e-06, %v1612_v56 }
 0x274   : > { %v1605_v58 = vpop.xlane.xlu1 %1604  ;;  %v1608_v59 = vpop.xlane.xlu0 %1607 }
 0x275   : > { %4460 = vrsqrt.f32 %v1616_v57  ;;  %v1613_v60 = vmul.f32 0.03125, %v1605_v58  ;;  %v1614_v61 = vmul.f32 0.03125, %v1608_v59 }
 0x277   : > { %v1617_v62 = vadd.f32 1e-06, %v1613_v60  ;;  %v1618_v63 = vadd.f32 1e-06, %v1614_v61 }
 0x278   : > { %v1611_v0 = vpop.xlane.xlu1 %1610 }
 0x279   : > { %4462 = vrsqrt.f32 %v1617_v62  ;;  %v1615_v1 = vmul.f32 0.03125, %v1611_v0 }
 0x27a   : > { %4464 = vrsqrt.f32 %v1618_v63 }
 0x27b   : > { %v1619_v2 = vadd.f32 1e-06, %v1615_v1 }
 0x27d   : > { %4466 = vrsqrt.f32 %v1619_v2 }
 0x282   : > { %v4461_v3 = vpop.eup %4460 }
 0x283   : > { %v1624_v4 = vmul.f32 %v4461_v3, %v1592_v36 }
 0x285   : > { %v1634_v8 = vmul.f32 %v3895_v5, %v1624_v4 }
 0x286   : > { %v4463_v6 = vpop.eup %4462 }
 0x287   : > { %v4465_v7 = vpop.eup %4464  ;;  %v1625_v9 = vmul.f32 %v4463_v6, %v1593_v44  ;;  %v1644_v16 = vadd.f32 %v3896_v11, %v1634_v8 }
 0x288   : > { %v1626_v10 = vmul.f32 %v4465_v7, %v1594_v37 }
 0x289   : > { %v1635_v12 = vmul.f32 %v3895_v5, %v1625_v9 }
 0x28a   : > { %v4467_v13 = vpop.eup %4466  ;;  %v1636_v14 = vmul.f32 %v3895_v5, %v1626_v10  ;;  %v1568_v10 = vlaneseq }
 0x28b   : > { %v1627_v15 = vmul.f32 %v4467_v13, %v1595_v45  ;;  %v1645_v17 = vadd.f32 %v3896_v11, %v1635_v12  ;;  %v4620_v12 = vmov -1e+09  }
 0x28c   : > { %v1646_v20 = vadd.f32 %v3896_v11, %v1636_v14 }
 0x28d   : > { %v1637_v18 = vmul.f32 %v3895_v5, %v1627_v15  ;;  %v5093_v19 = vpack.c.bf16 %v1645_v17, %v1644_v16 }
 0x28f   : > { %4142 = vmatprep.mubr.msk.bf16.mxu0 %vm1574_vm7, %v5093_v19  ;;  %v1647_v21 = vadd.f32 %v3896_v11, %v1637_v18  ;;  %v1569_v11 = vand.u32 127, %v1568_v10 }
 0x291   : > { %v5097_v22 = vpack.c.bf16 %v1647_v21, %v1646_v20  ;;  %vm1570_vm11 = vcmp.lt.s32.totalorder %v1569_v11, 5 }
 0x292   : > { %v5149_v13 = vsel %vm1570_vm11, 0.0, %v4620_v12 }
 0x293   : > { %4143 = vmatmul.mubr.msk.bf16.vlgmr.msra.gmra.mxu0 %vm1574_vm7, %v5097_v22 }
 0x294   : > { %4147 = vmatpush3.bf16.msra.mxu0 %v4438_v54  ;;  %4150 = vmatprep.mubr.msk.bf16.mxu0 %vm1574_vm7, %v5093_v19 }
 0x295   : > { %4148 = vmatprep.subr.bf16.mxu0 %v4439_v23 }
 0x298   : > { %4149 = vmatpush3.bf16.msra.mxu0 %v4439_v23 }
 0x299   : > { %4154 = vmatprep.subr.bf16.mxu0 %v4440_v24 }
 0x29b   : > { %4151 = vmatmul.mubr.msk.bf16.vlgmr.msra.gmra.mxu0 %vm1574_vm7, %v5097_v22 }
 0x29c   : > { %4155 = vmatpush3.bf16.msra.mxu0 %v4440_v24  ;;  %4158 = vmatprep.mubr.msk.bf16.mxu0 %vm1574_vm7, %v5093_v19 }
 0x29d   : > { %4156 = vmatprep.subr.bf16.mxu0 %v4441_v25 }
 0x2a0   : > { %4157 = vmatpush3.bf16.msra.mxu0 %v4441_v25 }
 0x2a1   : > { %4168 = vmatprep.subr.bf16.mxu0 %v4618_v26 }
 0x2a3   : > { %4159 = vmatmul.mubr.msk.bf16.vlgmr.msra.gmra.mxu0 %vm1574_vm7, %v5097_v22 }
 0x2a4   : > { %4170 = vmatprep.mubr.msk.bf16.mxu0 %vm4619_vm8, %v4618_v26 }
 0x353   : > { %v4144_v27 = vpop.f32.mrf.mxu0 }
 0x354   : > { %v1860_v54 = vadd.f32 %v4144_v27, %v3909_v35 }
 0x355   : > { %v1706_v28 = vpop.f32.mrf.mxu0 }
 0x356   : > { %v1858_v37 = vadd.f32 %v3909_v35, %v1706_v28  ;;  %v1864_v62 = vmul.f32 0.25, %v1860_v54 }
 0x357   : > { %v4145_v29 = vpop.f32.mrf.mxu0 }
 0x358   : > { %v1862_v45 = vmul.f32 0.25, %v1858_v37  ;;  %v1861_v63 = vadd.f32 %v4145_v29, %v3909_v35  ;;  %v1890_v4 = vpack.c.bf16 %v1864_v62, %v1864_v62 }
 0x359   : > { %v1709_v30 = vpop.f32.mrf.mxu0 }
 0x35a   : > { %v1859_v46 = vadd.f32 %v3909_v35, %v1709_v30  ;;  %v1888_v55 = vpack.c.bf16 %v1862_v45, %v1862_v45  ;;  %v1865_v5 = vmul.f32 0.25, %v1861_v63 }
 0x35b   : > { %v4152_v31 = vpop.f32.mrf.mxu0 }
 0x35c   : > { %v1875_v41 = vadd.f32 %v4152_v31, %v3910_v32  ;;  %v1863_v56 = vmul.f32 0.25, %v1859_v46  ;;  %v1891_v8 = vpack.c.bf16 %v1865_v5, %v1865_v5 }
 0x35d   : > { %v1771_v33 = vpop.f32.mrf.mxu0 }
 0x35e   : > { %v1873_v34 = vadd.f32 %v3910_v32, %v1771_v33  ;;  %v1894_v50 = vpack.c.bf16 %v1875_v41, %v1875_v41  ;;  %v1889_v0 = vpack.c.bf16 %v1863_v56, %v1863_v56 }
 0x35f   : > { %v4153_v36 = vpop.f32.mrf.mxu0 }
 0x360   : > { %v1892_v38 = vpack.c.bf16 %v1873_v34, %v1873_v34  ;;  %v1876_v51 = vadd.f32 %v4153_v36, %v3910_v32  ;;  %v1993_v58 = vsel %vm1896_vm9, %v1894_v50, 0 }
 0x361   : > { %v1774_v39 = vpop.f32.mrf.mxu0 }
 0x362   : > { %v1874_v42 = vadd.f32 %v3910_v32, %v1774_v39  ;;  %v1901_v43 = vsel %vm1896_vm9, %v1892_v38, 0  ;;  %v1895_v59 = vpack.c.bf16 %v1876_v51, %v1876_v51 }
 0x363   : > { %v4160_v44 = vpop.f32.mrf.mxu0  ;;  %4163 = vmatpush3.bf16.xpose.msra.mxu1 %v1901_v43 }
 0x364   : > { %v1893_v47 = vpack.c.bf16 %v1874_v42, %v1874_v42  ;;  %v5122_v48 = vadd.f32 %v4160_v44, %v3911_v40  ;;  %4174 = vmatprep.subr.bf16.mxu1 %v4618_v26  ;;  %v2039_v1 = vsel %vm1896_vm9, %v1895_v59, 0 }
 0x365   : > { %v1836_v49 = vpop.f32.mrf.mxu0 }
 0x366   : > { %v1947_v52 = vsel %vm1896_vm9, %v1893_v47, 0  ;;  %v1884_v60 = vadd.f32 %v3911_v40, %v1836_v49 }
 0x367   : > { %v4161_v53 = vpop.f32.mrf.mxu0  ;;  %4169 = vmatpush3.bf16.xpose.msra.mxu0 %v1947_v52 }
 0x368   : > { %v5126_v57 = vadd.f32 %v4161_v53, %v3911_v40  ;;  %4180 = vmatprep.subr.bf16.mxu0 %v4618_v26  ;;  %v2130_v2 = vpack.c.bf16 %v1884_v60, %v1884_v60 }
 0x369   : > { %v1839_v61 = vpop.f32.mrf.mxu0 }
 0x36a   : > { %4165 = vmatmul.mubr.msk.bf16.vlgmr.msra.gmra.mxu1 %vm1896_vm9, %v1888_v55  ;;  %v1885_v3 = vadd.f32 %v3911_v40, %v1839_v61  ;;  %v2139_v6 = vsel %vm2137_vm10, %v2130_v2, 0  ;;  %v2133_v10 = vpack.c.bf16 %v5126_v57, %v5126_v57 }
 0x36b   : > { %4175 = vmatpush3.bf16.xpose.msra.mxu1 %v1993_v58  ;;  %4176 = vmatprep.mubr.msk.bf16.mxu1 %vm4619_vm8, %v4618_v26 }
 0x36c   : > { %4186 = vmatprep.subr.bf16.mxu1 %v4618_v26  ;;  %v2131_v7 = vpack.c.bf16 %v1885_v3, %v1885_v3 }
 0x36e   : > { %4171 = vmatmul.mubr.msk.bf16.vlgmr.msra.gmra.mxu0 %vm1896_vm9, %v1889_v0  ;;  %v2185_v9 = vsel %vm2137_vm10, %v2131_v7, 0  ;;  %v4442_v7 = vld [vmem:[%s4848_s21 + $0x18] sm:$0xff]  }
 0x36f   : > { %4181 = vmatpush3.bf16.xpose.msra.mxu0 %v2039_v1  ;;  %4182 = vmatprep.mubr.msk.bf16.mxu0 %vm4619_vm8, %v4618_v26 }
 0x370   : > { %4192 = vmatprep.subr.bf16.mxu0 %v4618_v26 }
 0x372   : > { %4177 = vmatmul.mubr.msk.bf16.vlgmr.msra.gmra.mxu1 %vm1896_vm9, %v1890_v4  ;;  %v2132_v4 = vpack.c.bf16 %v5122_v48, %v5122_v48  ;;  %v4444_v48 = vld [vmem:[%s5535_s3 + $0x18] sm:$0xff]  }
 0x373   : > { %4187 = vmatpush3.bf16.msra.mxu1 %v2139_v6  ;;  %4188 = vmatprep.mubr.msk.bf16.mxu1 %vm4619_vm8, %v4618_v26 }
 0x374   : > { %4198 = vmatprep.subr.bf16.mxu1 %v4618_v26 }
 0x376   : > { %4183 = vmatmul.mubr.msk.bf16.vlgmr.msra.gmra.mxu0 %vm1896_vm9, %v1891_v8 }
 0x377   : > { %4193 = vmatpush3.bf16.msra.mxu0 %v2185_v9  ;;  %4194 = vmatprep.mubr.msk.bf16.mxu0 %vm4619_vm8, %v4618_v26  ;;  %v2231_v9 = vsel %vm2137_vm10, %v2132_v4, 0 }
 0x378   : > { %4204 = vmatprep.subr.bf16.mxu0 %v4618_v26 }
 0x42a   : > { %v1937_v14 = vpop.f32.mrf.mxu1 }
 0x42b   : > { %v1938_v15 = vadd.f32 %v1937_v14, %v5149_v13 }
 0x42c   : > { %v4166_v16 = vpop.f32.mrf.mxu1 }
 0x42d   : > { %v2082_v17 = vsel %vm2081_vm12, %v1938_v15, -inf }
 0x42e   : > { %2083 = vmax.xlane.f32.xlu1 %v2082_v17  ;;  %v1940_v18 = vpop.f32.mrf.mxu1  ;;  %v1983_v20 = vpop.f32.mrf.mxu0  ;;  %v4443_v17 = vld [vmem:[%s4848_s21 + $0x10] sm:$0xff]  }
 0x42f   : > { %v1984_v21 = vadd.f32 %v1983_v20, %v5149_v13 }
 0x430   : > { %v4167_v23 = vpop.f32.mrf.mxu1  ;;  %v4172_v24 = vpop.f32.mrf.mxu0 }
 0x431   : > { %v2085_v25 = vsel %vm2081_vm12, %v1984_v21, -inf  ;;  %v4445_v23 = vld [vmem:[%s5535_s3 + $0x10] sm:$0xff]   ;;  %v4446_v24 = vld [vmem:[%s4869_s25 + $0x18] sm:$0xff]  }
 0x432   : > { %v2029_v27 = vpop.f32.mrf.mxu1  ;;  %2086 = vmax.xlane.f32.xlu0 %v2085_v25  ;;  %v1986_v28 = vpop.f32.mrf.mxu0  ;;  %v4447_v25 = vld [vmem:[%s4869_s25 + $0x10] sm:$0xff]  }
 0x433   : > { %v2030_v29 = vadd.f32 %v2029_v27, %v5149_v13 }
 0x434   : > { %v4173_v30 = vpop.f32.mrf.mxu0  ;;  %v4178_v31 = vpop.f32.mrf.mxu1 }
 0x435   : > { %v2088_v32 = vsel %vm2081_vm12, %v2030_v29, -inf }
 0x436   : > { %2089 = vmax.xlane.f32.xlu1 %v2088_v32  ;;  %v2032_v33 = vpop.f32.mrf.mxu1  ;;  %v2075_v34 = vpop.f32.mrf.mxu0 }
 0x437   : > { %v2076_v35 = vadd.f32 %v2075_v34, %v5149_v13 }
 0x438   : > { %v4179_v36 = vpop.f32.mrf.mxu1  ;;  %v4184_v37 = vpop.f32.mrf.mxu0 }
 0x439   : > { %v2091_v38 = vsel %vm2081_vm12, %v2076_v35, -inf }
 0x43a   : > { %2092 = vmax.xlane.f32.xlu0 %v2091_v38  ;;  %v2078_v39 = vpop.f32.mrf.mxu0 }
 0x43c   : > { %v4185_v40 = vpop.f32.mrf.mxu0 }
 0x4b7   : > { %v2084_v41 = vpop.xlane.xlu1 %2083 }
 0x4b8   : > { %v2094_v42 = vsub.f32 %v1938_v15, %v2084_v41  ;;  %v2277_v15 = vsel %vm2137_vm10, %v2133_v10, 0 }
 0x4ba   : > { %v2098_v43 = vmul.f32 1.442695, %v2094_v42 }
 0x4bb   : > { %v2087_v44 = vpop.xlane.xlu0 %2086 }
 0x4bc   : > { %4468 = vpow2.f32 %v2098_v43  ;;  %v2095_v45 = vsub.f32 %v1984_v21, %v2087_v44 }
 0x4be   : > { %v2100_v46 = vmul.f32 1.442695, %v2095_v45 }
 0x4bf   : > { %v2090_v47 = vpop.xlane.xlu1 %2089 }
 0x4c0   : > { %4470 = vpow2.f32 %v2100_v46  ;;  %v2096_v49 = vsub.f32 %v2030_v29, %v2090_v47 }
 0x4c2   : > { %v2102_v50 = vmul.f32 1.442695, %v2096_v49 }
 0x4c3   : > { %v2093_v51 = vpop.xlane.xlu0 %2092 }
 0x4c4   : > { %4472 = vpow2.f32 %v2102_v50  ;;  %v2097_v52 = vsub.f32 %v2076_v35, %v2093_v51  ;;  %v3947_v50 = vld [vmem:[%s5540_s17 + $0x1] ss:$0 sm:$0xff] }
 0x4c5   : > { %v3949_v51 = vld [vmem:[%s4874_s8 + $0x1] ss:$0 sm:$0xff] }
 0x4c6   : > { %v2104_v53 = vmul.f32 1.442695, %v2097_v52 }
 0x4c8   : > { %4474 = vpow2.f32 %v2104_v53 }
 0x4c9   : > { %v4469_v54 = vpop.eup %4468 }
 0x4ca   : > { %v2106_v55 = vsel %vm2081_vm12, %v4469_v54, 0.0 }
 0x4cb   : > { %2107 = vadd.xlane.f32.xlu1 %v2106_v55  ;;  %v3945_v55 = vld [vmem:[%s5541_s18 + $0x1] ss:$0 sm:$0xff] }
 0x4cd   : > { %v4471_v56 = vpop.eup %4470 }
 0x4ce   : > { %v2109_v58 = vsel %vm2081_vm12, %v4471_v56, 0.0 }
 0x4cf   : > { %2110 = vadd.xlane.f32.xlu0 %v2109_v58 }
 0x4d1   : > { %v4473_v59 = vpop.eup %4472 }
 0x4d2   : > { %v2112_v60 = vsel %vm2081_vm12, %v4473_v59, 0.0 }
 0x4d3   : > { %2113 = vadd.xlane.f32.xlu1 %v2112_v60 }
 0x4d5   : > { %v4475_v61 = vpop.eup %4474 }
 0x4d6   : > { %v2115_v62 = vsel %vm2081_vm12, %v4475_v61, 0.0 }
 0x4d7   : > { %2116 = vadd.xlane.f32.xlu0 %v2115_v62 }
 0x554   : > { %v2108_v63 = vpop.xlane.xlu1 %2107 }
 0x555   : > { %4476 = vrcp.f32 %v2108_v63 }
 0x558   : > { %v2111_v0 = vpop.xlane.xlu0 %2110 }
 0x559   : > { %4478 = vrcp.f32 %v2111_v0 }
 0x55c   : > { %v2114_v1 = vpop.xlane.xlu1 %2113 }
 0x55d   : > { %4480 = vrcp.f32 %v2114_v1 }
 0x560   : > { %v2117_v2 = vpop.xlane.xlu0 %2116 }
 0x561   : > { %4482 = vrcp.f32 %v2117_v2 }
 0x562   : > { %v4477_v3 = vpop.eup %4476 }
 0x563   : > { %v2119_v5 = vmul.f32 %v4477_v3, %v4469_v54 }
 0x565   : > { %v2126_v6 = vpack.c.bf16 %v2119_v5, %v2119_v5 }
 0x566   : > { %v4479_v8 = vpop.eup %4478 }
 0x567   : > { %4189 = vmatmul.mubr.msk.bf16.vlgmr.msra.gmra.mxu1 %vm2081_vm12, %v2126_v6  ;;  %v2121_v11 = vmul.f32 %v4479_v8, %v4471_v56 }
 0x568   : > { %4199 = vmatpush3.bf16.msra.mxu1 %v2231_v9  ;;  %4200 = vmatprep.mubr.msk.bf16.mxu1 %vm4619_vm8, %v4618_v26 }
 0x569   : > { %v2127_v12 = vpack.c.bf16 %v2121_v11, %v2121_v11  ;;  %4210 = vmatprep.subr.bf16.mxu1 %v4442_v7 }
 0x56a   : > { %v4481_v14 = vpop.eup %4480 }
 0x56b   : > { %4195 = vmatmul.mubr.msk.bf16.vlgmr.msra.gmra.mxu0 %vm2081_vm12, %v2127_v12  ;;  %v2123_v16 = vmul.f32 %v4481_v14, %v4473_v59 }
 0x56c   : > { %4205 = vmatpush3.bf16.msra.mxu0 %v2277_v15  ;;  %4206 = vmatprep.mubr.msk.bf16.mxu0 %vm4619_vm8, %v4618_v26 }
 0x56d   : > { %v2128_v57 = vpack.c.bf16 %v2123_v16, %v2123_v16  ;;  %4218 = vmatprep.subr.bf16.mxu0 %v4444_v48 }
 0x56e   : > { %v4483_v18 = vpop.eup %4482 }
 0x56f   : > { %4201 = vmatmul.mubr.msk.bf16.vlgmr.msra.gmra.mxu1 %vm2081_vm12, %v2128_v57  ;;  %v2125_v20 = vmul.f32 %v4483_v18, %v4475_v61 }
 0x570   : > { %4211 = vmatpush3.bf16.msra.mxu1 %v4442_v7  ;;  %4214 = vmatprep.mubr.msk.bf16.mxu1 %vm1574_vm7, %v5093_v19 }
 0x571   : > { %v2129_v21 = vpack.c.bf16 %v2125_v20, %v2125_v20  ;;  %4212 = vmatprep.subr.bf16.mxu1 %v4443_v17 }
 0x573   : > { %4207 = vmatmul.mubr.msk.bf16.vlgmr.msra.gmra.mxu0 %vm2081_vm12, %v2129_v21 }
 0x574   : > { %4213 = vmatpush3.bf16.msra.mxu1 %v4443_v17  ;;  %4219 = vmatpush3.bf16.msra.mxu0 %v4444_v48 }
 0x575   : > { %4222 = vmatprep.mubr.msk.bf16.mxu0 %vm1574_vm7, %v5093_v19  ;;  %4220 = vmatprep.subr.bf16.mxu0 %v4445_v23 }
 0x576   : > { %4226 = vmatprep.subr.bf16.mxu1 %v4446_v24 }
 0x577   : > { %4215 = vmatmul.mubr.msk.bf16.vlgmr.msra.gmra.mxu1 %vm1574_vm7, %v5097_v22 }
 0x578   : > { %4221 = vmatpush3.bf16.msra.mxu0 %v4445_v23  ;;  %4227 = vmatpush3.bf16.msra.mxu1 %v4446_v24 }
 0x579   : > { %4230 = vmatprep.mubr.msk.bf16.mxu1 %vm1574_vm7, %v5093_v19  ;;  %4228 = vmatprep.subr.bf16.mxu1 %v4447_v25 }
 0x57a   : > { %4234 = vmatprep.subr.bf16.mxu0 %v4618_v26 }
 0x57b   : > { %4223 = vmatmul.mubr.msk.bf16.vlgmr.msra.gmra.mxu0 %vm1574_vm7, %v5097_v22 }
 0x57c   : > { %4229 = vmatpush3.bf16.msra.mxu1 %v4447_v25  ;;  %4236 = vmatprep.mubr.msk.bf16.mxu0 %vm4619_vm8, %v4618_v26 }
 0x57d   : > { %4240 = vmatprep.subr.bf16.mxu1 %v4618_v26 }
 0x57f   : > { %4231 = vmatmul.mubr.msk.bf16.vlgmr.msra.gmra.mxu1 %vm1574_vm7, %v5097_v22 }
 0x580   : > { %4242 = vmatprep.mubr.msk.bf16.mxu1 %vm4619_vm8, %v4618_v26 }
 0x627   : > { %v5201_v27 = vpop.f32.mrf.mxu1 }
 0x629   : > { %v4190_v19 = vpop.f32.mrf.mxu1 }
 0x62b   : > { %v2178_v28 = vpop.f32.mrf.mxu1  ;;  %v5203_v29 = vpop.f32.mrf.mxu0 }
 0x62c   : > { %v2319_v30 = vpack.c.bf16 %v5203_v29, %v5201_v27 }
 0x62d   : > { %v4191_v31 = vpop.f32.mrf.mxu1  ;;  %v4196_v32 = vpop.f32.mrf.mxu0 }
 0x62f   : > { %v2224_v33 = vpop.f32.mrf.mxu0  ;;  %v5207_v34 = vpop.f32.mrf.mxu1 }
 0x631   : > { %v4197_v35 = vpop.f32.mrf.mxu0  ;;  %v4202_v22 = vpop.f32.mrf.mxu1 }
 0x633   : > { %v2270_v36 = vpop.f32.mrf.mxu1  ;;  %v5209_v37 = vpop.f32.mrf.mxu0 }
 0x634   : > { %v2320_v38 = vpack.c.bf16 %v5209_v37, %v5207_v34 }
 0x635   : > { %v4203_v39 = vpop.f32.mrf.mxu1  ;;  %v4208_v40 = vpop.f32.mrf.mxu0 }
 0x637   : > { %v2316_v41 = vpop.f32.mrf.mxu0  ;;  %v4216_v42 = vpop.f32.mrf.mxu1 }
 0x638   : > { %v2531_v10 = vadd.f32 %v4216_v42, %v3945_v55 }
 0x639   : > { %v4209_v43 = vpop.f32.mrf.mxu0  ;;  %v2374_v44 = vpop.f32.mrf.mxu1 }
 0x63a   : > { %v2529_v56 = vadd.f32 %v3945_v55, %v2374_v44  ;;  %v2535_v17 = vmul.f32 0.25, %v2531_v10 }
 0x63b   : > { %v4217_v45 = vpop.f32.mrf.mxu1  ;;  %v4224_v46 = vpop.f32.mrf.mxu0 }
 0x63c   : > { %v2547_v63 = vadd.f32 %v4224_v46, %v3947_v50  ;;  %v2533_v5 = vmul.f32 0.25, %v2529_v56  ;;  %v2532_v16 = vadd.f32 %v4217_v45, %v3945_v55  ;;  %v2563_v24 = vpack.c.bf16 %v2535_v17, %v2535_v17 }
 0x63d   : > { %v2377_v47 = vpop.f32.mrf.mxu1  ;;  %v2440_v49 = vpop.f32.mrf.mxu0 }
 0x63e   : > { %v2545_v52 = vadd.f32 %v3947_v50, %v2440_v49  ;;  %v2530_v2 = vadd.f32 %v3945_v55, %v2377_v47  ;;  %v2567_v8 = vpack.c.bf16 %v2547_v63, %v2547_v63  ;;  %v2561_v11 = vpack.c.bf16 %v2533_v5, %v2533_v5 }
 0x63f   : > { %v4225_v53 = vpop.f32.mrf.mxu0  ;;  %v4232_v54 = vpop.f32.mrf.mxu1  ;;  %v2536_v23 = vmul.f32 0.25, %v2532_v16 }
 0x640   : > { %v2565_v58 = vpack.c.bf16 %v2545_v52, %v2545_v52  ;;  %v5216_v59 = vadd.f32 %v4232_v54, %v3949_v51  ;;  %v2548_v6 = vadd.f32 %v4225_v53, %v3947_v50  ;;  %v2534_v9 = vmul.f32 0.25, %v2530_v2 }
 0x641   : > { %v2443_v60 = vpop.f32.mrf.mxu0  ;;  %v2506_v61 = vpop.f32.mrf.mxu1  ;;  %v2665_v48 = vsel %vm1896_vm9, %v2567_v8, 0  ;;  %v2564_v28 = vpack.c.bf16 %v2536_v23, %v2536_v23 }
 0x642   : > { %v2546_v62 = vadd.f32 %v3947_v50, %v2443_v60  ;;  %v2573_v0 = vsel %vm1896_vm9, %v2565_v58, 0  ;;  %v2568_v12 = vpack.c.bf16 %v2548_v6, %v2548_v6  ;;  %v2557_v14 = vadd.f32 %v3949_v51, %v2506_v61 }
 0x643   : > { %v4233_v1 = vpop.f32.mrf.mxu1  ;;  %4235 = vmatpush3.bf16.xpose.msra.mxu0 %v2573_v0  ;;  %v2562_v57 = vpack.c.bf16 %v2534_v9, %v2534_v9  ;;  %v2803_v23 = vpack.c.bf16 %v5216_v59, %v5216_v59 }
 0x644   : > { %v2566_v3 = vpack.c.bf16 %v2546_v62, %v2546_v62  ;;  %v5219_v4 = vadd.f32 %v4233_v1, %v3949_v51  ;;  %4246 = vmatprep.subr.bf16.mxu0 %v4618_v26  ;;  %v2711_v18 = vsel %vm1896_vm9, %v2568_v12, 0  ;;  %v2801_v21 = vpack.c.bf16 %v2557_v14, %v2557_v14 }
 0x645   : > { %v2509_v15 = vpop.f32.mrf.mxu1 }
 0x646   : > { %v2619_v7 = vsel %vm1896_vm9, %v2566_v3, 0  ;;  %v2558_v20 = vadd.f32 %v3949_v51, %v2509_v15  ;;  %v2809_v19 = vsel %vm2137_vm10, %v2801_v21, 0 }
 0x647   : > { %4241 = vmatpush3.bf16.xpose.msra.mxu1 %v2619_v7 }
 0x648   : > { %4252 = vmatprep.subr.bf16.mxu1 %v4618_v26  ;;  %v2802_v25 = vpack.c.bf16 %v2558_v20, %v2558_v20 }
 0x64a   : > { %4237 = vmatmul.mubr.msk.bf16.vlgmr.msra.gmra.mxu0 %vm1896_vm9, %v2561_v11  ;;  %v2855_v31 = vsel %vm2137_vm10, %v2802_v25, 0 }
 0x64b   : > { %4247 = vmatpush3.bf16.xpose.msra.mxu0 %v2665_v48  ;;  %4248 = vmatprep.mubr.msk.bf16.mxu0 %vm4619_vm8, %v4618_v26 }
 0x64c   : > { %4258 = vmatprep.subr.bf16.mxu0 %v4618_v26 }
 0x64e   : > { %4243 = vmatmul.mubr.msk.bf16.vlgmr.msra.gmra.mxu1 %vm1896_vm9, %v2562_v57 }
 0x64f   : > { %4253 = vmatpush3.bf16.xpose.msra.mxu1 %v2711_v18  ;;  %4254 = vmatprep.mubr.msk.bf16.mxu1 %vm4619_vm8, %v4618_v26 }
 0x650   : > { %4264 = vmatprep.subr.bf16.mxu1 %v4618_v26 }
 0x652   : > { %4249 = vmatmul.mubr.msk.bf16.vlgmr.msra.gmra.mxu0 %vm1896_vm9, %v2563_v24 }
 0x653   : > { %4259 = vmatpush3.bf16.msra.mxu0 %v2809_v19  ;;  %4260 = vmatprep.mubr.msk.bf16.mxu0 %vm4619_vm8, %v4618_v26 }
 0x654   : > { %4270 = vmatprep.subr.bf16.mxu0 %v4618_v26 }
 0x656   : > { %4255 = vmatmul.mubr.msk.bf16.vlgmr.msra.gmra.mxu1 %vm1896_vm9, %v2564_v28  ;;  %v2804_v28 = vpack.c.bf16 %v5219_v4, %v5219_v4 }
 0x657   : > { %4265 = vmatpush3.bf16.msra.mxu1 %v2855_v31  ;;  %4266 = vmatprep.mubr.msk.bf16.mxu1 %vm4619_vm8, %v4618_v26 }
 0x658   : > { %4276 = vmatprep.subr.bf16.mxu1 %v4618_v26  ;;  %v2947_v59 = vsel %vm2137_vm10, %v2804_v28, 0 }
 0x70a   : > { %v2609_v32 = vpop.f32.mrf.mxu0 }
 0x70b   : > { %v2610_v33 = vadd.f32 %v2609_v32, %v5149_v13  ;;  %v2901_v32 = vsel %vm2137_vm10, %v2803_v23, 0 }
 0x70c   : > { %v4238_v35 = vpop.f32.mrf.mxu0 }
 0x70d   : > { %v2753_v22 = vsel %vm2081_vm12, %v2610_v33, -inf  ;;  %v4448_v35 = vld [vmem:[%s4880_s6] sm:$0xff]  }
 0x70e   : > { %v2655_v36 = vpop.f32.mrf.mxu1  ;;  %2754 = vmax.xlane.f32.xlu0 %v2753_v22  ;;  %v2612_v39 = vpop.f32.mrf.mxu0 }
 0x70f   : > { %v2656_v40 = vadd.f32 %v2655_v36, %v5149_v13 }
 0x710   : > { %v4244_v41 = vpop.f32.mrf.mxu1  ;;  %v4239_v42 = vpop.f32.mrf.mxu0 }
 0x711   : > { %v2756_v43 = vsel %vm2081_vm12, %v2656_v40, -inf }
 0x712   : > { %2757 = vmax.xlane.f32.xlu1 %v2756_v43  ;;  %v2658_v44 = vpop.f32.mrf.mxu1  ;;  %v2701_v45 = vpop.f32.mrf.mxu0 }
 0x713   : > { %v2702_v46 = vadd.f32 %v2701_v45, %v5149_v13 }
 0x714   : > { %v4245_v47 = vpop.f32.mrf.mxu1  ;;  %v4250_v49 = vpop.f32.mrf.mxu0 }
 0x715   : > { %v2759_v50 = vsel %vm2081_vm12, %v2702_v46, -inf }
 0x716   : > { %v2747_v51 = vpop.f32.mrf.mxu1  ;;  %2760 = vmax.xlane.f32.xlu0 %v2759_v50  ;;  %v2704_v52 = vpop.f32.mrf.mxu0 }
 0x717   : > { %v2748_v53 = vadd.f32 %v2747_v51, %v5149_v13 }
 0x718   : > { %v4256_v54 = vpop.f32.mrf.mxu1  ;;  %v4251_v55 = vpop.f32.mrf.mxu0 }
 0x719   : > { %v2762_v56 = vsel %vm2081_vm12, %v2748_v53, -inf }
 0x71a   : > { %2763 = vmax.xlane.f32.xlu1 %v2762_v56  ;;  %v2750_v58 = vpop.f32.mrf.mxu1 }
 0x71c   : > { %v4257_v60 = vpop.f32.mrf.mxu1 }
 0x797   : > { %v2755_v61 = vpop.xlane.xlu0 %2754 }
 0x798   : > { %v2765_v62 = vsub.f32 %v2610_v33, %v2755_v61 }
 0x79a   : > { %v2769_v63 = vmul.f32 1.442695, %v2765_v62 }
 0x79b   : > { %v2758_v0 = vpop.xlane.xlu1 %2757 }
 0x79c   : > { %v2766_v1 = vsub.f32 %v2656_v40, %v2758_v0  ;;  %4484 = vpow2.f32 %v2769_v63 }
 0x79e   : > { %v2771_v2 = vmul.f32 1.442695, %v2766_v1 }
 0x79f   : > { %v2761_v3 = vpop.xlane.xlu0 %2760 }
 0x7a0   : > { %4486 = vpow2.f32 %v2771_v2  ;;  %v2767_v5 = vsub.f32 %v2702_v46, %v2761_v3  ;;  %v3967_v2 = vld [vmem:[%s5543_s30] ss:$0 sm:$0xff] }
 0x7a2   : > { %v2773_v6 = vmul.f32 1.442695, %v2767_v5 }
 0x7a3   : > { %v2764_v7 = vpop.xlane.xlu1 %2763 }
 0x7a4   : > { %v2768_v13 = vsub.f32 %v2748_v53, %v2764_v7  ;;  %4488 = vpow2.f32 %v2773_v6 }
 0x7a6   : > { %v2775_v8 = vmul.f32 1.442695, %v2768_v13 }
 0x7a8   : > { %4490 = vpow2.f32 %v2775_v8 }
 0x7a9   : > { %v4485_v9 = vpop.eup %4484 }
 0x7aa   : > { %v2777_v10 = vsel %vm2081_vm12, %v4485_v9, 0.0 }
 0x7ab   : > { %2778 = vadd.xlane.f32.xlu0 %v2777_v10 }
 0x7ad   : > { %v4487_v11 = vpop.eup %4486 }
 0x7ae   : > { %v2780_v12 = vsel %vm2081_vm12, %v4487_v11, 0.0 }
 0x7af   : > { %2781 = vadd.xlane.f32.xlu1 %v2780_v12 }
 0x7b1   : > { %v4489_v48 = vpop.eup %4488 }
 0x7b2   : > { %v2783_v14 = vsel %vm2081_vm12, %v4489_v48, 0.0 }
 0x7b3   : > { %2784 = vadd.xlane.f32.xlu0 %v2783_v14 }
 0x7b5   : > { %v4491_v15 = vpop.eup %4490 }
 0x7b6   : > { %v2786_v16 = vsel %vm2081_vm12, %v4491_v15, 0.0 }
 0x7b7   : > { %2787 = vadd.xlane.f32.xlu1 %v2786_v16 }
 0x834   : > { %v2779_v57 = vpop.xlane.xlu0 %2778 }
 0x835   : > { %4492 = vrcp.f32 %v2779_v57 }
 0x838   : > { %v2782_v17 = vpop.xlane.xlu1 %2781 }
 0x839   : > { %4494 = vrcp.f32 %v2782_v17  ;;  %v4517_v17 = vld [vmem:[#allocation2 + $0x10] sm:$0xff] }
 0x83c   : > { %v2785_v18 = vpop.xlane.xlu0 %2784 }
 0x83d   : > { %4496 = vrcp.f32 %v2785_v18 }
 0x840   : > { %v2788_v20 = vpop.xlane.xlu1 %2787 }
 0x841   : > { %4498 = vrcp.f32 %v2788_v20  ;;  %v4518_v20 = vld [vmem:[#allocation2 + $0x8] sm:$0xff] }
 0x842   : > { %v4493_v21 = vpop.eup %4492 }
 0x843   : > { %v2790_v24 = vmul.f32 %v4493_v21, %v4485_v9 }
 0x845   : > { %v2797_v19 = vpack.c.bf16 %v2790_v24, %v2790_v24 }
 0x846   : > { %v4495_v25 = vpop.eup %4494 }
 0x847   : > { %v2792_v31 = vmul.f32 %v4495_v25, %v4487_v11  ;;  %4261 = vmatmul.mubr.msk.bf16.vlgmr.msra.gmra.mxu0 %vm2081_vm12, %v2797_v19  ;;  %v4519_v25 = vld [vmem:[#allocation2 + $0x18] sm:$0xff] }
 0x848   : > { %4271 = vmatpush3.bf16.msra.mxu0 %v2901_v32  ;;  %4272 = vmatprep.mubr.msk.bf16.mxu0 %vm4619_vm8, %v4618_v26 }
 0x849   : > { %v2798_v33 = vpack.c.bf16 %v2792_v31, %v2792_v31 }
 0x84a   : > { %v4497_v22 = vpop.eup %4496 }
 0x84b   : > { %4267 = vmatmul.mubr.msk.bf16.vlgmr.msra.gmra.mxu1 %vm2081_vm12, %v2798_v33  ;;  %v2794_v36 = vmul.f32 %v4497_v22, %v4489_v48  ;;  %v4516_v48 = vld [vmem:[#allocation2] sm:$0xff] }
 0x84c   : > { %4277 = vmatpush3.bf16.msra.mxu1 %v2947_v59  ;;  %4278 = vmatprep.mubr.msk.bf16.mxu1 %vm4619_vm8, %v4618_v26  ;;  %v4449_v26 = vld [vmem:[%s4880_s6 + $0x8] sm:$0xff]   ;;  %s5542_s6 = scalar_lea.vmem %s5444_s14, %s4829_s5  ;;  %s5550_s5 = sld [smem:[#allocation9_spill]] }
 0x84d   : > { %4288 = vmatprep.subr.bf16.mxu1 %v4448_v35  ;;  %v2799_v39 = vpack.c.bf16 %v2794_v36, %v2794_v36  ;;  %4282 = vmatprep.subr.bf16.mxu0 %v4449_v26  ;;  %v3966_v60 = vld [vmem:[%s5542_s6] ss:$0 sm:$0xff] }
 0x84e   : > { %v4499_v4 = vpop.eup %4498 }
 0x84f   : > { %v2796_v40 = vmul.f32 %v4499_v4, %v4491_v15  ;;  %4273 = vmatmul.mubr.msk.bf16.vlgmr.msra.gmra.mxu0 %vm2081_vm12, %v2799_v39 }
 0x850   : > { %4283 = vmatpush3.bf16.msra.mxu0 %v4449_v26 }
 0x851   : > { %v2800_v41 = vpack.c.bf16 %v2796_v40, %v2796_v40 }
 0x852   : > { %p3985_p1 = scmp.ne.s32.totalorder %s5550_s5, 1 }
 0x853   : > { %4279 = vmatmul.mubr.msk.bf16.vlgmr.msra.gmra.mxu1 %vm2081_vm12, %v2800_v41  ;;  %s5551_s8 = sld [smem:[#allocation40_spill]] (!%p3985_p1) }
 0x854   : > { %4290 = vmatprep.mubr.msk.bf16.mxu1 %vm1896_vm9, %v2319_v30  ;;  %4289 = vmatpush3.bf16.msra.mxu1 %v4448_v35 }
 0x85b   : > { %4291 = vmatmul.mubr.msk.bf16.vlgmr.msra.gmra.mxu1 %vm1896_vm9, %v2320_v38 }
 0x907   : > { %v2845_v42 = vpop.f32.mrf.mxu0 }
 0x909   : > { %v4262_v43 = vpop.f32.mrf.mxu0 }
 0x90b   : > { %v2891_v44 = vpop.f32.mrf.mxu1  ;;  %v2848_v45 = vpop.f32.mrf.mxu0 }
 0x90c   : > { %v2989_v46 = vpack.c.bf16 %v2891_v44, %v2845_v42 }
 0x90d   : > { %v4268_v47 = vpop.f32.mrf.mxu1  ;;  %v4263_v49 = vpop.f32.mrf.mxu0 }
 0x90e   : > { %4284 = vmatprep.mubr.msk.bf16.mxu0 %vm1896_vm9, %v2989_v46 }
 0x90f   : > { %v2894_v27 = vpop.f32.mrf.mxu1  ;;  %v2937_v29 = vpop.f32.mrf.mxu0 }
 0x911   : > { %v4269_v30 = vpop.f32.mrf.mxu1  ;;  %v4274_v50 = vpop.f32.mrf.mxu0 }
 0x912   : > { %v4451_v30 = vld [vmem:[%s4901_s2] sm:$0xff]  }
 0x913   : > { %v2983_v34 = vpop.f32.mrf.mxu1  ;;  %v2940_v37 = vpop.f32.mrf.mxu0 }
 0x914   : > { %v2990_v38 = vpack.c.bf16 %v2983_v34, %v2937_v29  ;;  %v4450_v29 = vld [vmem:[%s4901_s2 + $0x8] sm:$0xff]   ;;  %s5552_s2 = sld [smem:[#allocation41_spill]] (!%p3985_p1) }
 0x915   : > { %v4280_v51 = vpop.f32.mrf.mxu1  ;;  %v4275_v52 = vpop.f32.mrf.mxu0  ;;  %4294 = vmatprep.subr.bf16.mxu0 %v4450_v29 }
 0x916   : > { %4285 = vmatmul.mubr.msk.bf16.vlgmr.msra.gmra.mxu0 %vm1896_vm9, %v2990_v38 }
 0x917   : > { %v2986_v53 = vpop.f32.mrf.mxu1  ;;  %4295 = vmatpush3.bf16.msra.mxu0 %v4450_v29 }
 0x918   : > { %4296 = vmatprep.subr.bf16.mxu0 %v4451_v30 }
 0x919   : > { %v4281_v54 = vpop.f32.mrf.mxu1 }
 0x91b   : > { %v4292_v55 = vpop.f32.mrf.mxu1  ;;  %4297 = vmatpush3.bf16.msra.mxu0 %v4451_v30 }
 0x91d   : > { %v3101_v56 = vpop.f32.mrf.mxu1 }
 0x91f   : > { %v4293_v62 = vpop.f32.mrf.mxu1 }
 0x921   : > { %v3104_v7 = vpop.f32.mrf.mxu1 }
 0x9d6   : > { %v4286_v58 = vpop.f32.mrf.mxu0 }
 0x9d7   : > { %v3110_v61 = vadd.f32 %v4292_v55, %v4286_v58 }
 0x9d8   : > { %v3040_v63 = vpop.f32.mrf.mxu0 }
 0x9d9   : > { %v3126_v0 = vadd.f32 %v3966_v60, %v3110_v61  ;;  %v3102_v1 = vadd.f32 %v3101_v56, %v3040_v63  ;;  %v3968_v63 = vld [vmem:[%s5544_s24] ss:$0 sm:$0xff] }
 0x9da   : > { %v4287_v3 = vpop.f32.mrf.mxu0 }
 0x9db   : > { %v3124_v5 = vadd.f32 %v3966_v60, %v3102_v1  ;;  %v3113_v6 = vadd.f32 %v4293_v62, %v4287_v3  ;;  %v3136_v8 = vmul.f32 %v3967_v2, %v3126_v0 }
 0x9dc   : > { %v3043_v13 = vpop.f32.mrf.mxu0 }
 0x9dd   : > { %v3134_v9 = vmul.f32 %v3967_v2, %v3124_v5  ;;  %v3127_v10 = vadd.f32 %v3966_v60, %v3113_v6  ;;  %v3105_v11 = vadd.f32 %v3104_v7, %v3043_v13  ;;  %v5296_v18 = vadd.f32 %v4517_v17, %v3136_v8  ;;  %v3969_v6 = vld [vmem:[%s5546_s9] ss:$0 sm:$0xff]  ;;  %v4452_v17 = vld [vmem:[%s4911_s23 + $0x38] sm:$0xff]  }
 0x9de   : > { %4302 = vmatprep.subr.bf16.mxu1 %v4452_v17 }
 0x9df   : > { %v3125_v12 = vadd.f32 %v3966_v60, %v3105_v11  ;;  %v5292_v14 = vadd.f32 %v4516_v48, %v3134_v9  ;;  %v3137_v15 = vmul.f32 %v3967_v2, %v3127_v10  ;;  %v3150_v24 = vsel %vm1574_vm7, %v5296_v18, 0.0  ;;  %4303 = vmatpush3.bf16.msra.mxu1 %v4452_v17 }
 0x9e1   : > { %v3135_v16 = vmul.f32 %v3967_v2, %v3125_v12  ;;  %v3144_v57 = vsel %vm1574_vm7, %v5292_v14, 0.0  ;;  %v5304_v19 = vadd.f32 %v4519_v25, %v3137_v15  ;;  %v4456_v25 = vld [vmem:[%s4911_s23 + $0x18] sm:$0xff]  }
 0x9e2   : > { %3145 = vadd.xlane.f32.xlu0 %v3144_v57 }
 0x9e3   : > { %v5298_v21 = vadd.f32 %v4518_v20, %v3135_v16  ;;  %v3153_v28 = vsel %vm1574_vm7, %v5304_v19, 0.0  ;;  %v4453_v20 = vld [vmem:[%s4911_s23 + $0x30] sm:$0xff]  }
 0x9e4   : > { %4304 = vmatprep.subr.bf16.mxu1 %v4453_v20 }
 0x9e5   : > { %v3147_v23 = vsel %vm1574_vm7, %v5298_v21, 0.0  ;;  %4305 = vmatpush3.bf16.msra.mxu1 %v4453_v20 }
 0x9e6   : > { %3148 = vadd.xlane.f32.xlu1 %v3147_v23  ;;  %3151 = vadd.xlane.f32.xlu0 %v3150_v24  ;;  %v4454_v23 = vld [vmem:[%s4911_s23 + $0x28] sm:$0xff]   ;;  %v4455_v24 = vld [vmem:[%s4911_s23 + $0x20] sm:$0xff]  }
 0x9e7   : > { %4306 = vmatprep.subr.bf16.mxu1 %v4454_v23 }
 0x9e9   : > { %4307 = vmatpush3.bf16.msra.mxu1 %v4454_v23 }
 0x9ea   : > { %3154 = vadd.xlane.f32.xlu1 %v3153_v28  ;;  %4308 = vmatprep.subr.bf16.mxu1 %v4455_v24  ;;  %v4457_v28 = vld [vmem:[%s4911_s23 + $0x10] sm:$0xff]  }
 0x9ed   : > { %4309 = vmatpush3.bf16.msra.mxu1 %v4455_v24 }
 0x9ee   : > { %4310 = vmatprep.subr.bf16.mxu1 %v4456_v25 }
 0x9f1   : > { %4311 = vmatpush3.bf16.msra.mxu1 %v4456_v25 }
 0x9f2   : > { %4312 = vmatprep.subr.bf16.mxu1 %v4457_v28 }
 0x9f5   : > { %4313 = vmatpush3.bf16.msra.mxu1 %v4457_v28 }
 0xa6b   : > { %v3146_v31 = vpop.xlane.xlu0 %3145 }
 0xa6c   : > { %v3156_v32 = vmul.f32 0.03125, %v3146_v31  ;;  %v4458_v31 = vld [vmem:[%s4911_s23 + $0x8] sm:$0xff]  }
 0xa6d   : > { %4314 = vmatprep.subr.bf16.mxu1 %v4458_v31 }
 0xa6e   : > { %v3160_v33 = vsub.f32 %v5292_v14, %v3156_v32  ;;  %4315 = vmatpush3.bf16.msra.mxu1 %v4458_v31  ;;  %v4459_v32 = vld [vmem:[%s4911_s23] sm:$0xff]  }
 0xa6f   : > { %v3149_v35 = vpop.xlane.xlu1 %3148  ;;  %v3152_v22 = vpop.xlane.xlu0 %3151  ;;  %4316 = vmatprep.subr.bf16.mxu1 %v4459_v32 }
 0xa70   : > { %v3157_v59 = vmul.f32 0.03125, %v3149_v35  ;;  %v3158_v36 = vmul.f32 0.03125, %v3152_v22  ;;  %v3164_v4 = vmul.f32 %v3160_v33, %v3160_v33 }
 0xa72   : > { %v3161_v39 = vsub.f32 %v5298_v21, %v3157_v59  ;;  %v3162_v40 = vsub.f32 %v5296_v18, %v3158_v36  ;;  %v3168_v41 = vsel %vm1574_vm7, %v3164_v4, 0.0  ;;  %4317 = vmatpush3.bf16.msra.mxu1 %v4459_v32 }
 0xa73   : > { %v3155_v26 = vpop.xlane.xlu1 %3154  ;;  %3169 = vadd.xlane.f32.xlu0 %v3168_v41 }
 0xa74   : > { %v3159_v42 = vmul.f32 0.03125, %v3155_v26  ;;  %v3165_v43 = vmul.f32 %v3161_v39, %v3161_v39  ;;  %v3166_v44 = vmul.f32 %v3162_v40, %v3162_v40 }
 0xa76   : > { %v3163_v45 = vsub.f32 %v5304_v19, %v3159_v42  ;;  %v3171_v46 = vsel %vm1574_vm7, %v3165_v43, 0.0  ;;  %v3174_v47 = vsel %vm1574_vm7, %v3166_v44, 0.0 }
 0xa77   : > { %3172 = vadd.xlane.f32.xlu1 %v3171_v46  ;;  %3175 = vadd.xlane.f32.xlu0 %v3174_v47 }
 0xa78   : > { %v3167_v49 = vmul.f32 %v3163_v45, %v3163_v45 }
 0xa7a   : > { %v3177_v27 = vsel %vm1574_vm7, %v3167_v49, 0.0 }
 0xa7b   : > { %3178 = vadd.xlane.f32.xlu1 %v3177_v27 }
 0xafc   : > { %v3170_v50 = vpop.xlane.xlu0 %3169 }
 0xafd   : > { %v3180_v34 = vmul.f32 0.03125, %v3170_v50 }
 0xaff   : > { %v3184_v37 = vadd.f32 1e-06, %v3180_v34 }
 0xb00   : > { %v3173_v38 = vpop.xlane.xlu1 %3172  ;;  %v3176_v51 = vpop.xlane.xlu0 %3175 }
 0xb01   : > { %4500 = vrsqrt.f32 %v3184_v37  ;;  %v3181_v52 = vmul.f32 0.03125, %v3173_v38  ;;  %v3182_v53 = vmul.f32 0.03125, %v3176_v51 }
 0xb03   : > { %v3185_v54 = vadd.f32 1e-06, %v3181_v52  ;;  %v3186_v55 = vadd.f32 1e-06, %v3182_v53 }
 0xb04   : > { %v3179_v56 = vpop.xlane.xlu1 %3178 }
 0xb05   : > { %4502 = vrsqrt.f32 %v3185_v54  ;;  %v3183_v58 = vmul.f32 0.03125, %v3179_v56 }
 0xb06   : > { %4504 = vrsqrt.f32 %v3186_v55 }
 0xb07   : > { %v3187_v60 = vadd.f32 1e-06, %v3183_v58 }
 0xb09   : > { %4506 = vrsqrt.f32 %v3187_v60  ;;  %v3975_v60 = vld [vmem:[%s1073_s28] ss:$0 sm:$0xff] }
 0xb0e   : > { %v4501_v61 = vpop.eup %4500 }
 0xb0f   : > { %v3192_v62 = vmul.f32 %v4501_v61, %v3160_v33  ;;  %v3970_v33 = vld [vmem:[%s5547_s11] ss:$0 sm:$0xff] }
 0xb11   : > { %v3202_v3 = vmul.f32 %v3968_v63, %v3192_v62  ;;  %v3984_v62 = vld [vmem:[%s1076_s12] ss:$0 sm:$0xff] }
 0xb12   : > { %v4503_v0 = vpop.eup %4502 }
 0xb13   : > { %v4505_v1 = vpop.eup %4504  ;;  %v3193_v2 = vmul.f32 %v4503_v0, %v3161_v39  ;;  %v3212_v9 = vadd.f32 %v3969_v6, %v3202_v3 }
 0xb14   : > { %v3194_v5 = vmul.f32 %v4505_v1, %v3162_v40 }
 0xb15   : > { %v3203_v7 = vmul.f32 %v3968_v63, %v3193_v2 }
 0xb16   : > { %v4507_v13 = vpop.eup %4506  ;;  %v3204_v11 = vmul.f32 %v3968_v63, %v3194_v5 }
 0xb17   : > { %v3195_v8 = vmul.f32 %v4507_v13, %v3163_v45  ;;  %v3213_v10 = vadd.f32 %v3969_v6, %v3203_v7 }
 0xb18   : > { %v3214_v15 = vadd.f32 %v3969_v6, %v3204_v11 }
 0xb19   : > { %v3216_v12 = vpack.c.bf16 %v3213_v10, %v3212_v9  ;;  %v3205_v48 = vmul.f32 %v3968_v63, %v3195_v8 }
 0xb1b   : > { %4298 = vmatprep.mubr.msk.bf16.mxu0 %vm1574_vm7, %v3216_v12  ;;  %v3215_v16 = vadd.f32 %v3969_v6, %v3205_v48 }
 0xb1d   : > { %v3217_v57 = vpack.c.bf16 %v3215_v16, %v3214_v15 }
 0xb1f   : > { %4299 = vmatmul.mubr.msk.bf16.vlgmr.msra.gmra.mxu0 %vm1574_vm7, %v3217_v57 }
 0xbdf   : > { %v4300_v35 = vpop.f32.mrf.mxu0 }
 0xbe0   : > { %v3290_v22 = vadd.f32 %v4300_v35, %v3970_v33 }
 0xbe1   : > { %v3281_v59 = vpop.f32.mrf.mxu0 }
 0xbe2   : > { %v3282_v36 = vadd.f32 %v3970_v33, %v3281_v59  ;;  %v3302_v4 = vmul.f32 0.70710677, %v3290_v22  ;;  %v3298_v51 = vmul.f32 0.5, %v3290_v22 }
 0xbe3   : > { %v4301_v39 = vpop.f32.mrf.mxu0 }
 0xbe4   : > { %v3300_v40 = vmul.f32 0.70710677, %v3282_v36  ;;  %v3293_v41 = vadd.f32 %v4301_v39, %v3970_v33  ;;  %v3296_v34 = vmul.f32 0.5, %v3282_v36 }
 0xbe5   : > { %v3284_v26 = vpop.f32.mrf.mxu0 }
 0xbe6   : > { %4508 = verf.f32 %v3300_v40  ;;  %v3303_v42 = vmul.f32 0.70710677, %v3293_v41  ;;  %v3285_v43 = vadd.f32 %v3970_v33, %v3284_v26  ;;  %v3299_v50 = vmul.f32 0.5, %v3293_v41 }
 0xbe7   : > { %4510 = verf.f32 %v3302_v4 }
 0xbe8   : > { %4512 = verf.f32 %v3303_v42  ;;  %v3301_v44 = vmul.f32 0.70710677, %v3285_v43  ;;  %v3297_v37 = vmul.f32 0.5, %v3285_v43 }
 0xbea   : > { %4514 = verf.f32 %v3301_v44 }
 0xbf3   : > { %v4509_v45 = vpop.eup %4508 }
 0xbf4   : > { %v4511_v46 = vpop.eup %4510  ;;  %v3308_v49 = vadd.f32 1.0, %v4509_v45 }
 0xbf5   : > { %v4513_v47 = vpop.eup %4512  ;;  %v3310_v30 = vadd.f32 1.0, %v4511_v46 }
 0xbf6   : > { %v3311_v27 = vadd.f32 1.0, %v4513_v47  ;;  %v3312_v53 = vmul.f32 %v3308_v49, %v3296_v34 }
 0xbf7   : > { %v4515_v29 = vpop.eup %4514  ;;  %v3314_v55 = vmul.f32 %v3310_v30, %v3298_v51 }
 0xbf8   : > { %v3309_v38 = vadd.f32 1.0, %v4515_v29  ;;  %v3315_v52 = vmul.f32 %v3311_v27, %v3299_v50 }
 0xbfa   : > { %v3313_v54 = vmul.f32 %v3309_v38, %v3297_v37  ;;  %v3317_v58 = vpack.c.bf16 %v3315_v52, %v3314_v55 }
 0xbfc   : > { %v3316_v56 = vpack.c.bf16 %v3313_v54, %v3312_v53 }
 0xbfe   : > { %4318 = vmatprep.mubr.bf16.mxu1 %v3316_v56 }
 0xbff   : > { %4319 = vmatmul.mubr.bf16.vlgmr.msra.gmra.mxu1 %v3317_v58 }
 0xcbf   : > { %v4320_v61 = vpop.f32.mrf.mxu1 }
 0xcc0   : > { %v3432_v63 = vadd.f32 %v4320_v61, %v3975_v60 }
 0xcc1   : > { %v3423_v0 = vpop.f32.mrf.mxu1 }
 0xcc2   : > { %v3447_v1 = vmul.f32 %v3984_v62, %v3432_v63  ;;  %v3424_v2 = vadd.f32 %v3975_v60, %v3423_v0 }
 0xcc3   : > { %v4321_v3 = vpop.f32.mrf.mxu1 }
 0xcc4   : > { %v3451_v5 = vadd.f32 %v3447_v1, %v5296_v18  ;;  %v3445_v6 = vmul.f32 %v3984_v62, %v3424_v2  ;;  %v3435_v7 = vadd.f32 %v4321_v3, %v3975_v60 }
 0xcc5   : > { %v3426_v13 = vpop.f32.mrf.mxu1 }
 0xcc6   : > { %3455 = vst.msk [vmem:[#allocation2 + $0x10] sm:$0xff] %vm1574_vm7, %v3451_v5  ;;  %v3449_v8 = vadd.f32 %v3445_v6, %v5292_v14  ;;  %v3448_v9 = vmul.f32 %v3984_v62, %v3435_v7  ;;  %v3427_v10 = vadd.f32 %v3975_v60, %v3426_v13 }
 0xcc8   : > { %3453 = vst.msk [vmem:[#allocation2] sm:$0xff] %vm1574_vm7, %v3449_v8  ;;  %v3452_v11 = vadd.f32 %v3448_v9, %v5304_v19  ;;  %v3446_v12 = vmul.f32 %v3984_v62, %v3427_v10  ;;  %3460 = sbr.rel (%p3985_p1) target bundleno = 3605 (0xe15), region = 128 }
 0xcca   : > { %3456 = vst.msk [vmem:[#allocation2 + $0x18] sm:$0xff] %vm1574_vm7, %v3452_v11  ;;  %v3450_v48 = vadd.f32 %v3446_v12, %v5298_v21 }
 0xccc   : > { %3454 = vst.msk [vmem:[#allocation2 + $0x8] sm:$0xff] %vm1574_vm7, %v3450_v48 }
 0xccd   : > { %v3467_v18 = vrot.slane %v3450_v48, 7  ;;  %vm3468_vm13 = vcmask 1041409   ;;  %v3470_v15 = vrot.slane %v3451_v5, 6  ;;  %vm3471_vm14 = vcmask 1042434   ;;  %v3986_v50 = vld [vmem:[%s5551_s8] ss:$0 sm:$0xff] }
 0xcce   : > { %v3473_v14 = vrot.slane %v3452_v11, 5  ;;  %vm3474_vm15 = vcmask 1043459   ;;  %vm3477_vm0 = vcmask 257024   ;;  %v3987_v55 = vld [vmem:[%s5552_s2] ss:$0 sm:$0xff] }
 0xccf   : > { %v3469_v16 = vsel %vm3468_vm13, %v3467_v18, %v3449_v8 }
 0xcd0   : > { %v3472_v19 = vsel %vm3471_vm14, %v3470_v15, %v3469_v16 }
 0xcd1   : > { %v3475_v57 = vsel %vm3474_vm15, %v3473_v14, %v3472_v19 }
 0xcd2   : > { %v3478_v21 = vsel %vm3477_vm0, %v3475_v57, 0.0 }
 0xcd3   : > { %3479 = vadd.xlane.f32.xlu0 %v3478_v21 }
 0xd5c   : > { %v3480_v17 = vpop.xlane.xlu0 %3479 }
 0xd5d   : > { %v3481_v20 = vmul.f32 0.03125, %v3480_v17 }
 0xd5f   : > { %v3483_v23 = vrot.slane %v3481_v20, 1  ;;  %v3484_v24 = vrot.slane %v3481_v20, 2  ;;  %v3485_v25 = vrot.slane %v3481_v20, 3  ;;  %v3490_v28 = vsub.f32 %v3449_v8, %v3481_v20 }
 0xd61   : > { %v3491_v31 = vsub.f32 %v3450_v48, %v3483_v23  ;;  %v3492_v32 = vsub.f32 %v3451_v5, %v3484_v24  ;;  %v3493_v33 = vsub.f32 %v3452_v11, %v3485_v25  ;;  %v3494_v36 = vmul.f32 %v3490_v28, %v3490_v28 }
 0xd63   : > { %v3495_v35 = vmul.f32 %v3491_v31, %v3491_v31  ;;  %v3496_v22 = vmul.f32 %v3492_v32, %v3492_v32  ;;  %v3497_v59 = vmul.f32 %v3493_v33, %v3493_v33 }
 0xd65   : > { %v3502_v4 = vrot.slane %v3495_v35, 7  ;;  %v3504_v39 = vrot.slane %v3496_v22, 6  ;;  %v3506_v41 = vrot.slane %v3497_v59, 5 }
 0xd67   : > { %v3503_v40 = vsel %vm3468_vm13, %v3502_v4, %v3494_v36 }
 0xd68   : > { %v3505_v26 = vsel %vm3471_vm14, %v3504_v39, %v3503_v40 }
 0xd69   : > { %v3507_v42 = vsel %vm3474_vm15, %v3506_v41, %v3505_v26 }
 0xd6a   : > { %v3509_v43 = vsel %vm3477_vm0, %v3507_v42, 0.0 }
 0xd6b   : > { %3510 = vadd.xlane.f32.xlu0 %v3509_v43 }
 0xdf4   : > { %v3511_v44 = vpop.xlane.xlu0 %3510 }
 0xdf5   : > { %v3512_v45 = vmul.f32 0.03125, %v3511_v44 }
 0xdf7   : > { %v3513_v46 = vadd.f32 1e-06, %v3512_v45 }
 0xdf9   : > { %4520 = vrsqrt.f32 %v3513_v46 }
 0xe06   : > { %v4521_v47 = vpop.eup %4520 }
 0xe07   : > { %v3516_v49 = vrot.slane %v4521_v47, 1  ;;  %v3517_v27 = vrot.slane %v4521_v47, 2  ;;  %v3518_v29 = vrot.slane %v4521_v47, 3  ;;  %v3523_v30 = vmul.f32 %v4521_v47, %v3490_v28 }
 0xe09   : > { %v3524_v34 = vmul.f32 %v3516_v49, %v3491_v31  ;;  %v3525_v37 = vmul.f32 %v3517_v27, %v3492_v32  ;;  %v3526_v38 = vmul.f32 %v3518_v29, %v3493_v33  ;;  %v3533_v51 = vmul.f32 %v3986_v50, %v3523_v30 }
 0xe0b   : > { %v3534_v52 = vmul.f32 %v3986_v50, %v3524_v34  ;;  %v3535_v53 = vmul.f32 %v3986_v50, %v3525_v37  ;;  %v3536_v54 = vmul.f32 %v3986_v50, %v3526_v38  ;;  %v3543_v61 = vadd.f32 %v3987_v55, %v3533_v51 }
 0xe0d   : > { %v3544_v56 = vadd.f32 %v3987_v55, %v3534_v52  ;;  %v3545_v58 = vadd.f32 %v3987_v55, %v3535_v53  ;;  %v3546_v60 = vadd.f32 %v3987_v55, %v3536_v54 }
 0xe0f   : > { %v3551_v62 = vrot.slane %v3544_v56, 7  ;;  %v3553_v63 = vrot.slane %v3545_v58, 6  ;;  %v3555_v1 = vrot.slane %v3546_v60, 5 }
 0xe11   : > { %v3552_v0 = vsel %vm3468_vm13, %v3551_v62, %v3543_v61 }
 0xe12   : > { %v3554_v2 = vsel %vm3471_vm14, %v3553_v63, %v3552_v0 }
 0xe13   : > { %v3556_v3 = vsel %vm3474_vm15, %v3555_v1, %v3554_v2 }
 0xe14   : > { %3558 = vst.msk [vmem:[%s1000_s1] sm:$0xf] %vm3477_vm0, %v3556_v3 }
 0xe15 PF: > { %s5553_s3 = sld [smem:[#allocation10_spill]]  ;;  %s3573_s23 = sshll.u32 %s1000_s1, 4  ;;  %s3574_s23 = int_to_ptr.vmem [resolvable:$true] %s3573_s23 }
 0xe16   : > { %s5554_s24 = sld [smem:[#allocation7_spill]]  ;;  %s4522_s21 = scalar_lea.vmem %s3574_s23, 64 }
 0xe17   : > { %s5556_s7 = sld [smem:[#allocation42_spill]]  ;;  %p4523_p2 = scmp.ne.s32.totalorder %s3574_s23, %s4522_s21 }
 0xe18   : > { %s4621_s25 = smov [#allocation3]  }
 0xe19   : > { %p4524_p4 = pnand %p4523_p2, %p4801_p3  ;;  %s4526_s6 = sshll.u32 %s4621_s25, 4  ;;  %s4527_s6 = int_to_ptr.vmem [resolvable:$false] %s4526_s6 }
 0xe1a   : > { %s4528_s5 = scalar_lea.vmem %s4527_s6, 128  ;;  %p4529_p6 = scmp.lt.s32.totalorder %s3574_s23, %s4527_s6 }
 0xe1b   : > { %s3989_s27 = sshll.u32 %s5553_s3, 6  ;;  %p4525_p5 = pneg %p4524_p4 }
 0xe1c   : > { %s5558_s17 = sand.u32 1, %s5554_s24   ;;  %p4530_p7 = scmp.lt.s32.totalorder %s4528_s5, %s4522_s21 }
 0xe1d   : > { %s5557_s11 = smov %s5556_s7  ;;  %s3571_s26 = scalar_lea.hbm %s5556_s7, %s3989_s27 }
 0xe1e   : > { %s3560_s18 = scalar_lea.sflag [#allocation4], %s5558_s17  ;;  %p4531_p8 = por %p4530_p7, %p4529_p6 }
 0xe20   : > { %p4532_p10 = pnand %p4531_p8, %p4525_p5 }
 0xe22   : > { %4535 = shalt.err (!%p4532_p10)
}
 0xe23   : > { %s4536_s28 = scalar_lea.hbm %s3571_s26, 64  ;;  %s4540_s12 = scalar_lea.hbm %s5557_s11, 128 }
 0xe24   : > { %p4537_p11 = scmp.ne.s32.totalorder %s3571_s26, %s4536_s28  ;;  %p4541_p0 = scmp.lt.s32.totalorder %s3571_s26, %s5557_s11 }
 0xe25   : > { %p4542_p1 = scmp.lt.s32.totalorder %s4540_s12, %s4536_s28 }
 0xe26   : > { %p4538_p12 = pnand %p4537_p11, %p4801_p3 }
 0xe27   : > { %p4543_p2 = por %p4542_p1, %p4541_p0 }
 0xe28   : > { %p4539_p13 = pneg %p4538_p12 }
 0xe2a   : > { %p4544_p4 = pnand %p4543_p2, %p4539_p13 }
 0xe2c   : > { %4547 = shalt.err (!%p4544_p4)
}
 0xe2d   : > { %4323 = dma.vmem_to_hbm [thread:$0]  (%p4801_p3), %s3574_s23, 64, %s3571_s26, %s3560_s18  }
 0xe2e PF: > { %s5559_s30 = sld [smem:[#allocation13_spill]] }
 0xe2f   : > { %s5560_s2 = sld [smem:[#allocation6_spill]] }
 0xe34   : > { %p4329_p5 = scmp.ge.s32.totalorder %s5559_s30, 2 }
 0xe35   : > { %s3585_s24 = sand.u32 1, %s5560_s2  }
 0xe36   : > { %p4326_p6 = pnand %p4329_p5, %p4811_p9  ;;  %s3586_s27 = scalar_lea.sflag [#allocation4], %s3585_s24 }
 0xe38   : > { %p4327_p7 = pneg %p4326_p6 }
 0xe3a   : > { %4581 = dma.done.wait (%p4327_p7), %s3586_s27, 64  }
 0xe3b   : > { %4583 = vsyncadd (%p4327_p7), %s3586_s27, 4294967232  ;;  %s38_s1 = sadd.s32 1, %s5559_s30   ;;  %s5562_s29 = sld [smem:[#allocation7_spill]] }
 0xe3c   : > { %p35_p8 = scmp.ge.s32.totalorder %s38_s1, 6   ;;  %s5563_s2 = sld [smem:[#allocation8_spill]] }
 0xe3d   : > { %s5564_s6 = sld [smem:[#allocation18_spill]] }
 0xe3e   : > { %s5565_s30 = sld [smem:[#allocation11_spill]]  ;;  %37 = sbr.rel (!%p35_p8) target bundleno = 27 (0x1b), region = 227 }
 0xe3f   : > { %s5566_s7 = sld [smem:[#allocation12_spill]] }
 0xe40   : > { %s5567_s3 = sld [smem:[#allocation14_spill]] }
 0xe41   : > { %s5568_s26 = sld [smem:[#allocation16_spill]] }
 0xe43   :  { %3591 = vsyncpa [#allocation4], 1 }
 0xe44   :  { %3593 = vsyncpa [#allocation4 + $0x1], 1 }

</bundles_post_ra>
